<compile_context>
chip_gen: v6e
topology: v6e:2x2x1
jax: 0.10.0
libtpu: 0.0.40
codegen_flags: <defaults>
</compile_context>

<pallas_src>
import jax
import jax.numpy as jnp
from jax.experimental import pallas as pl
from jax.experimental.pallas import tpu as pltpu


def _sigmoid(x):
    return 1.0 / (1.0 + jnp.exp(-x))


# ---------------------------------------------------------------------------
# Fused kernel: 2-layer SAGE over all T snapshots + LSTM + dot-product predictor.
# ---------------------------------------------------------------------------
def _fused_kernel(a0_ref, x_ref, a1_ref,
                  ws0_ref, wn0_ref, b0_ref,
                  ws1_ref, wn1_ref, b1_ref,
                  wih_ref, whh_ref, bl_ref,
                  ssrc_ref, sdst_ref,
                  hs_ref, scores_ref):
    t_steps, n_dst0, n_src0 = a0_ref.shape
    n_dst1 = a1_ref.shape[1]
    n_lstm = whh_ref.shape[-1]

    b0 = b0_ref[...]                    # (1, H)  f32
    b1 = b1_ref[...]                    # (1, C)  f32
    x_flat = x_ref[...]                 # (T*S0, Fin) bf16

    # ---- SAGE layer 0: dense projections in ONE push each (M = T*S0) --------
    # A_mean @ (x W_neigh) == (A_mean x) W_neigh  (linearity), so project first.
    q0s = jnp.dot(x_flat, ws0_ref[...], preferred_element_type=jnp.float32)  # (T*S0, H)
    q0n = jnp.dot(x_flat, wn0_ref[...], preferred_element_type=jnp.float32)  # (T*S0, H)
    q0n_bf = q0n.astype(jnp.bfloat16)

    h0_list = []
    for t in range(t_steps):            # static unroll, T = 3
        lo = t * n_src0
        agg = jnp.dot(a0_ref[t], q0n_bf[lo:lo + n_src0],
                      preferred_element_type=jnp.float32)                    # (D0, H)
        h0 = jnp.maximum(q0s[lo:lo + n_dst0] + agg + b0, 0.0)
        # TODO(synk): nn.Dropout(0.2) between SAGE layers is identity in eval mode;
        # training-mode dropout is not modeled.
        h0_list.append(h0.astype(jnp.bfloat16))
    h0_all = jnp.concatenate(h0_list, axis=0)                                # (T*D0, H)

    # ---- SAGE layer 1 (no activation) ---------------------------------------
    q1s = jnp.dot(h0_all, ws1_ref[...], preferred_element_type=jnp.float32)  # (T*D0, C)
    q1n = jnp.dot(h0_all, wn1_ref[...], preferred_element_type=jnp.float32)  # (T*D0, C)
    q1n_bf = q1n.astype(jnp.bfloat16)

    hs_list = []
    for t in range(t_steps):
        lo = t * n_dst0
        agg = jnp.dot(a1_ref[t], q1n_bf[lo:lo + n_dst0],
                      preferred_element_type=jnp.float32)                    # (D1, C)
        hst = q1s[lo:lo + n_dst1] + agg + b1
        hs_ref[t] = hst
        hs_list.append(hst.astype(jnp.bfloat16))

    # ---- LSTM over T (PyTorch gate order i, f, g, o) -------------------------
    # Input projection for all timesteps hoisted out of the recurrence; per-gate
    # weights (leading gate dim) avoid intra-vreg lane slicing of a merged z.
    hs_flat = jnp.concatenate(hs_list, axis=0)                               # (T*D1, C)
    xg = [jnp.dot(hs_flat, wih_ref[g], preferred_element_type=jnp.float32) + bl_ref[g]
          for g in range(4)]                                                  # 4x (T*D1, H)

    h = jnp.zeros((n_dst1, n_lstm), jnp.float32)
    c = jnp.zeros((n_dst1, n_lstm), jnp.float32)
    for t in range(t_steps):
        lo = t * n_dst1
        h_bf = h.astype(jnp.bfloat16)
        z = [xg[g][lo:lo + n_dst1]
             + jnp.dot(h_bf, whh_ref[g], preferred_element_type=jnp.float32)
             for g in range(4)]
        i_g = _sigmoid(z[0])
        f_g = _sigmoid(z[1])
        g_g = jnp.tanh(z[2])
        o_g = _sigmoid(z[3])
        c = f_g * c + i_g * g_g
        h = o_g * jnp.tanh(c)

    # ---- dot-product predictor + sigmoid (lane-dense (2, E) output) ----------
    # Selectors are pre-transposed one-hots (N, E); reduce over sublanes (H) so
    # the per-graph score is a (1, E) row and the final store is one full block.
    ht_bf = h.T.astype(jnp.bfloat16)                                          # (H, N)
    rows = []
    for g in range(2):                                                        # 0=pos, 1=neg
        hu = jnp.dot(ht_bf, ssrc_ref[g], preferred_element_type=jnp.float32)  # (H, E)
        hv = jnp.dot(ht_bf, sdst_ref[g], preferred_element_type=jnp.float32)  # (H, E)
        rows.append(jnp.sum(hu * hv, axis=0, keepdims=True))                  # (1, E)
    scores_ref[...] = _sigmoid(jnp.concatenate(rows, axis=0))                 # (2, E)


# ---------------------------------------------------------------------------
# Full BatchModel forward (single fused pallas_call).
# ---------------------------------------------------------------------------
@jax.jit
def batch_model_forward(a0m, x_flat, a1m, sage_w, lstm_w, sel_src, sel_dst):
    t_steps, n_dst1, _ = a1m.shape
    n_classes = sage_w[3].shape[1]        # ws1: (H, C)
    n_edges = sel_src.shape[-1]
    vmem = pl.BlockSpec(memory_space=pltpu.MemorySpace.VMEM)
    hs, scores = pl.pallas_call(
        _fused_kernel,
        out_shape=(jax.ShapeDtypeStruct((t_steps, n_dst1, n_classes), jnp.float32),
                   jax.ShapeDtypeStruct((2, n_edges), jnp.float32)),
        in_specs=[vmem] * 14,
        out_specs=(vmem, vmem),
    )(a0m, x_flat, a1m, *sage_w, *lstm_w, sel_src, sel_dst)
    pos = scores[0].reshape(n_edges, 1)
    neg = scores[1].reshape(n_edges, 1)
    return pos, neg, hs


# ---------------------------------------------------------------------------
# One-time graph / parameter packing (preprocessing, not per-forward hot path).
# ---------------------------------------------------------------------------
def make_block(key, n_dst, n_src, p=0.3):
    adj = (jax.random.uniform(key, (n_dst, n_src)) < p).astype(jnp.float32)
    deg = adj.sum(axis=1, keepdims=True)
    inv_deg = 1.0 / jnp.maximum(deg, 1.0)        # DGL clamps zero in-degree to 1
    return adj, inv_deg


def make_sage_params(key, in_feats, n_hidden, n_classes):
    params = []
    for fi, fo in ((in_feats, n_hidden), (n_hidden, n_classes)):
        key, k1, k2 = jax.random.split(key, 3)
        scale = 1.0 / jnp.sqrt(jnp.float32(fi))
        params.append((jax.random.normal(k1, (fi, fo), jnp.float32) * scale,
                       jax.random.normal(k2, (fi, fo), jnp.float32) * scale,
                       jnp.zeros((fo,), jnp.float32)))
    return params


def make_lstm_params(key, feats):
    k1, k2, k3 = jax.random.split(key, 3)
    scale = 1.0 / jnp.sqrt(jnp.float32(feats))
    w_ih = jax.random.normal(k1, (feats, 4 * feats), jnp.float32) * scale
    w_hh = jax.random.normal(k2, (feats, 4 * feats), jnp.float32) * scale
    bias = jax.random.normal(k3, (4 * feats,), jnp.float32) * scale  # b_ih + b_hh
    return w_ih, w_hh, bias


def pack_history(blocks, inputs):
    """Fold 1/deg into adjacencies, flatten T into the feature-matrix M dim."""
    a0m = jnp.stack([a0 * inv0 for (a0, inv0), _ in blocks]).astype(jnp.bfloat16)
    a1m = jnp.stack([a1 * inv1 for _, (a1, inv1) in blocks]).astype(jnp.bfloat16)
    x_flat = jnp.concatenate(inputs, axis=0).astype(jnp.bfloat16)   # (T*S0, Fin)
    return a0m, x_flat, a1m


def pack_sage_params(params):
    (w_s0, w_n0, b0), (w_s1, w_n1, b1) = params
    return (w_s0.astype(jnp.bfloat16), w_n0.astype(jnp.bfloat16), b0.reshape(1, -1),
            w_s1.astype(jnp.bfloat16), w_n1.astype(jnp.bfloat16), b1.reshape(1, -1))


def pack_lstm_params(lstm_params):
    """Split merged 4H gate weights into a leading gate dim (i, f, g, o)."""
    w_ih, w_hh, bias = lstm_params
    feats = w_hh.shape[0]
    wih = jnp.stack([w_ih[:, g * feats:(g + 1) * feats] for g in range(4)])
    whh = jnp.stack([w_hh[:, g * feats:(g + 1) * feats] for g in range(4)])
    bl = jnp.stack([bias[g * feats:(g + 1) * feats].reshape(1, -1) for g in range(4)])
    return wih.astype(jnp.bfloat16), whh.astype(jnp.bfloat16), bl


def pack_pred_graph(edges, n_nodes):
    """Transposed one-hot selectors (n_nodes, n_edges) — edge dim lives on lanes."""
    src, dst = edges
    return (jax.nn.one_hot(src, n_nodes, dtype=jnp.float32).T.astype(jnp.bfloat16),
            jax.nn.one_hot(dst, n_nodes, dtype=jnp.float32).T.astype(jnp.bfloat16))


# ---------------------------------------------------------------------------
# Plain-JAX reference (DGL math, f32 everywhere) for the correctness check.
# ---------------------------------------------------------------------------
def ref_forward(blocks, inputs, sage_params, lstm_params, pos_edges, neg_edges):
    (w_s0, w_n0, b0), (w_s1, w_n1, b1) = sage_params
    hs = []
    for ((a0, inv0), (a1, inv1)), x in zip(blocks, inputs):
        agg = (a0 @ x) * inv0
        h = jnp.maximum(x[: a0.shape[0]] @ w_s0 + agg @ w_n0 + b0, 0.0)
        agg = (a1 @ h) * inv1
        h = h[: a1.shape[0]] @ w_s1 + agg @ w_n1 + b1
        hs.append(h)
    hs = jnp.stack(hs)

    w_ih, w_hh, bias = lstm_params
    n_hidden = w_hh.shape[0]
    h = jnp.zeros((hs.shape[1], n_hidden), jnp.float32)
    c = jnp.zeros_like(h)
    for t in range(hs.shape[0]):
        z = hs[t] @ w_ih + h @ w_hh + bias
        i_g = jax.nn.sigmoid(z[:, :n_hidden])
        f_g = jax.nn.sigmoid(z[:, n_hidden:2 * n_hidden])
        g_g = jnp.tanh(z[:, 2 * n_hidden:3 * n_hidden])
        o_g = jax.nn.sigmoid(z[:, 3 * n_hidden:])
        c = f_g * c + i_g * g_g
        h = o_g * jnp.tanh(c)

    def score(edges):
        src, dst = edges
        return jax.nn.sigmoid(jnp.sum(h[src] * h[dst], axis=-1, keepdims=True))

    return score(pos_edges), score(neg_edges), hs


if __name__ == "__main__":
    key = jax.random.PRNGKey(0)
    in_feats, n_hidden, out_features = 32, 32, 16     # n_layers = 2
    t_hist = 3                                        # history snapshots
    n_src0, n_dst0, n_dst1 = 64, 32, 16               # sampled block fan-in
    n_edges = 32                                      # edges per pos/neg graph

    blocks, inputs = [], []
    for _ in range(t_hist):                           # same sampling fan-out per step
        key, k0, k1, kx = jax.random.split(key, 4)
        blocks.append((make_block(k0, n_dst0, n_src0),
                       make_block(k1, n_dst1, n_dst0)))
        inputs.append(jax.random.normal(kx, (n_src0, in_feats), jnp.float32))

    key, kp, kl, ks0, kd0, ks1, kd1 = jax.random.split(key, 7)
    sage_params = make_sage_params(kp, in_feats, n_hidden, out_features)
    lstm_params = make_lstm_params(kl, out_features)
    pos_edges = (jax.random.randint(ks0, (n_edges,), 0, n_dst1),
                 jax.random.randint(kd0, (n_edges,), 0, n_dst1))
    neg_edges = (jax.random.randint(ks1, (n_edges,), 0, n_dst1),
                 jax.random.randint(kd1, (n_edges,), 0, n_dst1))

    # one-time packing
    a0m, x_flat, a1m = pack_history(blocks, inputs)
    sage_w = pack_sage_params(sage_params)
    lstm_w = pack_lstm_params(lstm_params)
    ps, pd = pack_pred_graph(pos_edges, n_dst1)
    ns, nd = pack_pred_graph(neg_edges, n_dst1)
    sel_src = jnp.stack([ps, ns])   # (2, N, E)
    sel_dst = jnp.stack([pd, nd])

    pos_score, neg_score, hs = jax.block_until_ready(
        batch_model_forward(a0m, x_flat, a1m, sage_w, lstm_w, sel_src, sel_dst))
    assert pos_score.shape == (n_edges, 1), pos_score.shape
    assert neg_score.shape == (n_edges, 1), neg_score.shape
    assert hs.shape == (t_hist, n_dst1, out_features), hs.shape

    ref_pos, ref_neg, ref_hs = ref_forward(blocks, inputs, sage_params,
                                           lstm_params, pos_edges, neg_edges)
    # hs: same math as the previously-validated kernel -> 3e-2; scores now run the
    # whole head (LSTM + predictor) with bf16 MXU operands -> slightly looser 5e-2.
    assert jnp.allclose(hs, ref_hs, atol=3e-2, rtol=3e-2), \
        float(jnp.max(jnp.abs(hs - ref_hs)))
    assert jnp.allclose(pos_score, ref_pos, atol=5e-2, rtol=5e-2), \
        float(jnp.max(jnp.abs(pos_score - ref_pos)))
    assert jnp.allclose(neg_score, ref_neg, atol=5e-2, rtol=5e-2), \
        float(jnp.max(jnp.abs(neg_score - ref_neg)))

    print("KERNEL_OK")
</pallas_src>

<mosaic_0001>
module attributes {stable_mosaic.version = 11 : i64} {
  func.func @_fused_kernel(%arg0: memref<3x32x64xbf16, #tpu.memory_space<vmem>>, %arg1: memref<192x32xbf16, #tpu.memory_space<vmem>>, %arg2: memref<3x16x32xbf16, #tpu.memory_space<vmem>>, %arg3: memref<32x32xbf16, #tpu.memory_space<vmem>>, %arg4: memref<32x32xbf16, #tpu.memory_space<vmem>>, %arg5: memref<1x32xf32, #tpu.memory_space<vmem>>, %arg6: memref<32x16xbf16, #tpu.memory_space<vmem>>, %arg7: memref<32x16xbf16, #tpu.memory_space<vmem>>, %arg8: memref<1x16xf32, #tpu.memory_space<vmem>>, %arg9: memref<4x16x16xbf16, #tpu.memory_space<vmem>>, %arg10: memref<4x16x16xbf16, #tpu.memory_space<vmem>>, %arg11: memref<4x1x16xf32, #tpu.memory_space<vmem>>, %arg12: memref<2x16x32xbf16, #tpu.memory_space<vmem>>, %arg13: memref<2x16x32xbf16, #tpu.memory_space<vmem>>, %arg14: memref<3x16x16xf32, #tpu.memory_space<vmem>>, %arg15: memref<2x32xf32, #tpu.memory_space<vmem>>) attributes {dimension_semantics = [], scalar_prefetch = 0 : i64, scratch_operands = 0 : i64, tpu.core_type = #tpu.core_type<tc>} {
    %c0 = arith.constant 0 : index
    %c0_0 = arith.constant 0 : index
    %0 = vector.load %arg5[%c0, %c0_0] : memref<1x32xf32, #tpu.memory_space<vmem>>, vector<1x32xf32>
    %c0_1 = arith.constant 0 : index
    %c0_2 = arith.constant 0 : index
    %1 = vector.load %arg8[%c0_1, %c0_2] : memref<1x16xf32, #tpu.memory_space<vmem>>, vector<1x16xf32>
    %c0_3 = arith.constant 0 : index
    %c0_4 = arith.constant 0 : index
    %2 = vector.load %arg1[%c0_3, %c0_4] : memref<192x32xbf16, #tpu.memory_space<vmem>>, vector<192x32xbf16>
    %c0_5 = arith.constant 0 : index
    %c0_6 = arith.constant 0 : index
    %3 = vector.load %arg3[%c0_5, %c0_6] : memref<32x32xbf16, #tpu.memory_space<vmem>>, vector<32x32xbf16>
    %cst = arith.constant dense<0.000000e+00> : vector<192x32xf32>
    %4 = tpu.matmul %2, %3, %cst {dimension_numbers = #tpu.dot_dimension_numbers<[1], [0], [0], [1], [0, 0, 1, 1], [], []>} : vector<192x32xbf16>, vector<32x32xbf16>, vector<192x32xf32> -> vector<192x32xf32>
    %c0_7 = arith.constant 0 : index
    %c0_8 = arith.constant 0 : index
    %5 = vector.load %arg4[%c0_7, %c0_8] : memref<32x32xbf16, #tpu.memory_space<vmem>>, vector<32x32xbf16>
    %cst_9 = arith.constant dense<0.000000e+00> : vector<192x32xf32>
    %6 = tpu.matmul %2, %5, %cst_9 {dimension_numbers = #tpu.dot_dimension_numbers<[1], [0], [0], [1], [0, 0, 1, 1], [], []>} : vector<192x32xbf16>, vector<32x32xbf16>, vector<192x32xf32> -> vector<192x32xf32>
    %7 = arith.truncf %6 : vector<192x32xf32> to vector<192x32xbf16>
    %c0_10 = arith.constant 0 : index
    %c0_11 = arith.constant 0 : index
    %c0_12 = arith.constant 0 : index
    %8 = vector.load %arg0[%c0_10, %c0_11, %c0_12] : memref<3x32x64xbf16, #tpu.memory_space<vmem>>, vector<1x32x64xbf16>
    %9 = vector.shape_cast %8 : vector<1x32x64xbf16> to vector<32x64xbf16>
    %10 = vector.extract_strided_slice %7 {offsets = [0, 0], sizes = [64, 32], strides = [1, 1]} : vector<192x32xbf16> to vector<64x32xbf16>
    %cst_13 = arith.constant dense<0.000000e+00> : vector<32x32xf32>
    %11 = tpu.matmul %9, %10, %cst_13 {dimension_numbers = #tpu.dot_dimension_numbers<[1], [0], [0], [1], [0, 0, 1, 1], [], []>} : vector<32x64xbf16>, vector<64x32xbf16>, vector<32x32xf32> -> vector<32x32xf32>
    %12 = vector.extract_strided_slice %4 {offsets = [0, 0], sizes = [32, 32], strides = [1, 1]} : vector<192x32xf32> to vector<32x32xf32>
    %13 = arith.addf %12, %11 : vector<32x32xf32>
    %14 = vector.broadcast %0 : vector<1x32xf32> to vector<32x32xf32>
    %15 = arith.addf %13, %14 : vector<32x32xf32>
    %cst_14 = arith.constant 0.000000e+00 : f32
    %16 = vector.broadcast %cst_14 : f32 to vector<32x32xf32>
    %17 = arith.maximumf %15, %16 : vector<32x32xf32>
    %18 = arith.truncf %17 : vector<32x32xf32> to vector<32x32xbf16>
    %c1 = arith.constant 1 : index
    %c0_15 = arith.constant 0 : index
    %c0_16 = arith.constant 0 : index
    %19 = vector.load %arg0[%c1, %c0_15, %c0_16] : memref<3x32x64xbf16, #tpu.memory_space<vmem>>, vector<1x32x64xbf16>
    %20 = vector.shape_cast %19 : vector<1x32x64xbf16> to vector<32x64xbf16>
    %21 = vector.extract_strided_slice %7 {offsets = [64, 0], sizes = [64, 32], strides = [1, 1]} : vector<192x32xbf16> to vector<64x32xbf16>
    %cst_17 = arith.constant dense<0.000000e+00> : vector<32x32xf32>
    %22 = tpu.matmul %20, %21, %cst_17 {dimension_numbers = #tpu.dot_dimension_numbers<[1], [0], [0], [1], [0, 0, 1, 1], [], []>} : vector<32x64xbf16>, vector<64x32xbf16>, vector<32x32xf32> -> vector<32x32xf32>
    %23 = vector.extract_strided_slice %4 {offsets = [64, 0], sizes = [32, 32], strides = [1, 1]} : vector<192x32xf32> to vector<32x32xf32>
    %24 = arith.addf %23, %22 : vector<32x32xf32>
    %25 = vector.broadcast %0 : vector<1x32xf32> to vector<32x32xf32>
    %26 = arith.addf %24, %25 : vector<32x32xf32>
    %cst_18 = arith.constant 0.000000e+00 : f32
    %27 = vector.broadcast %cst_18 : f32 to vector<32x32xf32>
    %28 = arith.maximumf %26, %27 : vector<32x32xf32>
    %29 = arith.truncf %28 : vector<32x32xf32> to vector<32x32xbf16>
    %c2 = arith.constant 2 : index
    %c0_19 = arith.constant 0 : index
    %c0_20 = arith.constant 0 : index
    %30 = vector.load %arg0[%c2, %c0_19, %c0_20] : memref<3x32x64xbf16, #tpu.memory_space<vmem>>, vector<1x32x64xbf16>
    %31 = vector.shape_cast %30 : vector<1x32x64xbf16> to vector<32x64xbf16>
    %32 = vector.extract_strided_slice %7 {offsets = [128, 0], sizes = [64, 32], strides = [1, 1]} : vector<192x32xbf16> to vector<64x32xbf16>
    %cst_21 = arith.constant dense<0.000000e+00> : vector<32x32xf32>
    %33 = tpu.matmul %31, %32, %cst_21 {dimension_numbers = #tpu.dot_dimension_numbers<[1], [0], [0], [1], [0, 0, 1, 1], [], []>} : vector<32x64xbf16>, vector<64x32xbf16>, vector<32x32xf32> -> vector<32x32xf32>
    %34 = vector.extract_strided_slice %4 {offsets = [128, 0], sizes = [32, 32], strides = [1, 1]} : vector<192x32xf32> to vector<32x32xf32>
    %35 = arith.addf %34, %33 : vector<32x32xf32>
    %36 = vector.broadcast %0 : vector<1x32xf32> to vector<32x32xf32>
    %37 = arith.addf %35, %36 : vector<32x32xf32>
    %cst_22 = arith.constant 0.000000e+00 : f32
    %38 = vector.broadcast %cst_22 : f32 to vector<32x32xf32>
    %39 = arith.maximumf %37, %38 : vector<32x32xf32>
    %40 = arith.truncf %39 : vector<32x32xf32> to vector<32x32xbf16>
    %41 = tpu.concatenate %18, %29, %40 in 0 : vector<32x32xbf16>, vector<32x32xbf16>, vector<32x32xbf16> -> vector<96x32xbf16>
    %c0_23 = arith.constant 0 : index
    %c0_24 = arith.constant 0 : index
    %42 = vector.load %arg6[%c0_23, %c0_24] : memref<32x16xbf16, #tpu.memory_space<vmem>>, vector<32x16xbf16>
    %cst_25 = arith.constant dense<0.000000e+00> : vector<96x16xf32>
    %43 = tpu.matmul %41, %42, %cst_25 {dimension_numbers = #tpu.dot_dimension_numbers<[1], [0], [0], [1], [0, 0, 1, 1], [], []>} : vector<96x32xbf16>, vector<32x16xbf16>, vector<96x16xf32> -> vector<96x16xf32>
    %c0_26 = arith.constant 0 : index
    %c0_27 = arith.constant 0 : index
    %44 = vector.load %arg7[%c0_26, %c0_27] : memref<32x16xbf16, #tpu.memory_space<vmem>>, vector<32x16xbf16>
    %cst_28 = arith.constant dense<0.000000e+00> : vector<96x16xf32>
    %45 = tpu.matmul %41, %44, %cst_28 {dimension_numbers = #tpu.dot_dimension_numbers<[1], [0], [0], [1], [0, 0, 1, 1], [], []>} : vector<96x32xbf16>, vector<32x16xbf16>, vector<96x16xf32> -> vector<96x16xf32>
    %46 = arith.truncf %45 : vector<96x16xf32> to vector<96x16xbf16>
    %c0_29 = arith.constant 0 : index
    %c0_30 = arith.constant 0 : index
    %c0_31 = arith.constant 0 : index
    %47 = vector.load %arg2[%c0_29, %c0_30, %c0_31] : memref<3x16x32xbf16, #tpu.memory_space<vmem>>, vector<1x16x32xbf16>
    %48 = vector.shape_cast %47 : vector<1x16x32xbf16> to vector<16x32xbf16>
    %49 = vector.extract_strided_slice %46 {offsets = [0, 0], sizes = [32, 16], strides = [1, 1]} : vector<96x16xbf16> to vector<32x16xbf16>
    %cst_32 = arith.constant dense<0.000000e+00> : vector<16x16xf32>
    %50 = tpu.matmul %48, %49, %cst_32 {dimension_numbers = #tpu.dot_dimension_numbers<[1], [0], [0], [1], [0, 0, 1, 1], [], []>} : vector<16x32xbf16>, vector<32x16xbf16>, vector<16x16xf32> -> vector<16x16xf32>
    %51 = vector.extract_strided_slice %43 {offsets = [0, 0], sizes = [16, 16], strides = [1, 1]} : vector<96x16xf32> to vector<16x16xf32>
    %52 = arith.addf %51, %50 : vector<16x16xf32>
    %53 = vector.broadcast %1 : vector<1x16xf32> to vector<16x16xf32>
    %54 = arith.addf %52, %53 : vector<16x16xf32>
    %c0_33 = arith.constant 0 : index
    %c0_34 = arith.constant 0 : index
    %c0_35 = arith.constant 0 : index
    %55 = vector.load %arg14[%c0_33, %c0_34, %c0_35] : memref<3x16x16xf32, #tpu.memory_space<vmem>>, vector<1x16x16xf32>
    %56 = vector.shape_cast %55 : vector<1x16x16xf32> to vector<16x16xf32>
    %57 = vector.shape_cast %54 : vector<16x16xf32> to vector<1x16x16xf32>
    tpu.vector_store %arg14[%c0_33, %c0_34, %c0_35], %57 {strides = array<i32>} : memref<3x16x16xf32, #tpu.memory_space<vmem>>, vector<1x16x16xf32>,
    %58 = arith.truncf %54 : vector<16x16xf32> to vector<16x16xbf16>
    %c1_36 = arith.constant 1 : index
    %c0_37 = arith.constant 0 : index
    %c0_38 = arith.constant 0 : index
    %59 = vector.load %arg2[%c1_36, %c0_37, %c0_38] : memref<3x16x32xbf16, #tpu.memory_space<vmem>>, vector<1x16x32xbf16>
    %60 = vector.shape_cast %59 : vector<1x16x32xbf16> to vector<16x32xbf16>
    %61 = vector.extract_strided_slice %46 {offsets = [32, 0], sizes = [32, 16], strides = [1, 1]} : vector<96x16xbf16> to vector<32x16xbf16>
    %cst_39 = arith.constant dense<0.000000e+00> : vector<16x16xf32>
    %62 = tpu.matmul %60, %61, %cst_39 {dimension_numbers = #tpu.dot_dimension_numbers<[1], [0], [0], [1], [0, 0, 1, 1], [], []>} : vector<16x32xbf16>, vector<32x16xbf16>, vector<16x16xf32> -> vector<16x16xf32>
    %63 = vector.extract_strided_slice %43 {offsets = [32, 0], sizes = [16, 16], strides = [1, 1]} : vector<96x16xf32> to vector<16x16xf32>
    %64 = arith.addf %63, %62 : vector<16x16xf32>
    %65 = vector.broadcast %1 : vector<1x16xf32> to vector<16x16xf32>
    %66 = arith.addf %64, %65 : vector<16x16xf32>
    %c1_40 = arith.constant 1 : index
    %c0_41 = arith.constant 0 : index
    %c0_42 = arith.constant 0 : index
    %67 = vector.load %arg14[%c1_40, %c0_41, %c0_42] : memref<3x16x16xf32, #tpu.memory_space<vmem>>, vector<1x16x16xf32>
    %68 = vector.shape_cast %67 : vector<1x16x16xf32> to vector<16x16xf32>
    %69 = vector.shape_cast %66 : vector<16x16xf32> to vector<1x16x16xf32>
    tpu.vector_store %arg14[%c1_40, %c0_41, %c0_42], %69 {strides = array<i32>} : memref<3x16x16xf32, #tpu.memory_space<vmem>>, vector<1x16x16xf32>,
    %70 = arith.truncf %66 : vector<16x16xf32> to vector<16x16xbf16>
    %c2_43 = arith.constant 2 : index
    %c0_44 = arith.constant 0 : index
    %c0_45 = arith.constant 0 : index
    %71 = vector.load %arg2[%c2_43, %c0_44, %c0_45] : memref<3x16x32xbf16, #tpu.memory_space<vmem>>, vector<1x16x32xbf16>
    %72 = vector.shape_cast %71 : vector<1x16x32xbf16> to vector<16x32xbf16>
    %73 = vector.extract_strided_slice %46 {offsets = [64, 0], sizes = [32, 16], strides = [1, 1]} : vector<96x16xbf16> to vector<32x16xbf16>
    %cst_46 = arith.constant dense<0.000000e+00> : vector<16x16xf32>
    %74 = tpu.matmul %72, %73, %cst_46 {dimension_numbers = #tpu.dot_dimension_numbers<[1], [0], [0], [1], [0, 0, 1, 1], [], []>} : vector<16x32xbf16>, vector<32x16xbf16>, vector<16x16xf32> -> vector<16x16xf32>
    %75 = vector.extract_strided_slice %43 {offsets = [64, 0], sizes = [16, 16], strides = [1, 1]} : vector<96x16xf32> to vector<16x16xf32>
    %76 = arith.addf %75, %74 : vector<16x16xf32>
    %77 = vector.broadcast %1 : vector<1x16xf32> to vector<16x16xf32>
    %78 = arith.addf %76, %77 : vector<16x16xf32>
    %c2_47 = arith.constant 2 : index
    %c0_48 = arith.constant 0 : index
    %c0_49 = arith.constant 0 : index
    %79 = vector.load %arg14[%c2_47, %c0_48, %c0_49] : memref<3x16x16xf32, #tpu.memory_space<vmem>>, vector<1x16x16xf32>
    %80 = vector.shape_cast %79 : vector<1x16x16xf32> to vector<16x16xf32>
    %81 = vector.shape_cast %78 : vector<16x16xf32> to vector<1x16x16xf32>
    tpu.vector_store %arg14[%c2_47, %c0_48, %c0_49], %81 {strides = array<i32>} : memref<3x16x16xf32, #tpu.memory_space<vmem>>, vector<1x16x16xf32>,
    %82 = arith.truncf %78 : vector<16x16xf32> to vector<16x16xbf16>
    %83 = tpu.concatenate %58, %70, %82 in 0 : vector<16x16xbf16>, vector<16x16xbf16>, vector<16x16xbf16> -> vector<48x16xbf16>
    %c0_50 = arith.constant 0 : index
    %c0_51 = arith.constant 0 : index
    %c0_52 = arith.constant 0 : index
    %84 = vector.load %arg9[%c0_50, %c0_51, %c0_52] : memref<4x16x16xbf16, #tpu.memory_space<vmem>>, vector<1x16x16xbf16>
    %85 = vector.shape_cast %84 : vector<1x16x16xbf16> to vector<16x16xbf16>
    %cst_53 = arith.constant dense<0.000000e+00> : vector<48x16xf32>
    %86 = tpu.matmul %83, %85, %cst_53 {dimension_numbers = #tpu.dot_dimension_numbers<[1], [0], [0], [1], [0, 0, 1, 1], [], []>} : vector<48x16xbf16>, vector<16x16xbf16>, vector<48x16xf32> -> vector<48x16xf32>
    %c0_54 = arith.constant 0 : index
    %c0_55 = arith.constant 0 : index
    %c0_56 = arith.constant 0 : index
    %87 = vector.load %arg11[%c0_54, %c0_55, %c0_56] : memref<4x1x16xf32, #tpu.memory_space<vmem>>, vector<1x1x16xf32>
    %88 = vector.shape_cast %87 : vector<1x1x16xf32> to vector<1x16xf32>
    %89 = vector.broadcast %88 : vector<1x16xf32> to vector<48x16xf32>
    %90 = arith.addf %86, %89 : vector<48x16xf32>
    %c1_57 = arith.constant 1 : index
    %c0_58 = arith.constant 0 : index
    %c0_59 = arith.constant 0 : index
    %91 = vector.load %arg9[%c1_57, %c0_58, %c0_59] : memref<4x16x16xbf16, #tpu.memory_space<vmem>>, vector<1x16x16xbf16>
    %92 = vector.shape_cast %91 : vector<1x16x16xbf16> to vector<16x16xbf16>
    %cst_60 = arith.constant dense<0.000000e+00> : vector<48x16xf32>
    %93 = tpu.matmul %83, %92, %cst_60 {dimension_numbers = #tpu.dot_dimension_numbers<[1], [0], [0], [1], [0, 0, 1, 1], [], []>} : vector<48x16xbf16>, vector<16x16xbf16>, vector<48x16xf32> -> vector<48x16xf32>
    %c1_61 = arith.constant 1 : index
    %c0_62 = arith.constant 0 : index
    %c0_63 = arith.constant 0 : index
    %94 = vector.load %arg11[%c1_61, %c0_62, %c0_63] : memref<4x1x16xf32, #tpu.memory_space<vmem>>, vector<1x1x16xf32>
    %95 = vector.shape_cast %94 : vector<1x1x16xf32> to vector<1x16xf32>
    %96 = vector.broadcast %95 : vector<1x16xf32> to vector<48x16xf32>
    %97 = arith.addf %93, %96 : vector<48x16xf32>
    %c2_64 = arith.constant 2 : index
    %c0_65 = arith.constant 0 : index
    %c0_66 = arith.constant 0 : index
    %98 = vector.load %arg9[%c2_64, %c0_65, %c0_66] : memref<4x16x16xbf16, #tpu.memory_space<vmem>>, vector<1x16x16xbf16>
    %99 = vector.shape_cast %98 : vector<1x16x16xbf16> to vector<16x16xbf16>
    %cst_67 = arith.constant dense<0.000000e+00> : vector<48x16xf32>
    %100 = tpu.matmul %83, %99, %cst_67 {dimension_numbers = #tpu.dot_dimension_numbers<[1], [0], [0], [1], [0, 0, 1, 1], [], []>} : vector<48x16xbf16>, vector<16x16xbf16>, vector<48x16xf32> -> vector<48x16xf32>
    %c2_68 = arith.constant 2 : index
    %c0_69 = arith.constant 0 : index
    %c0_70 = arith.constant 0 : index
    %101 = vector.load %arg11[%c2_68, %c0_69, %c0_70] : memref<4x1x16xf32, #tpu.memory_space<vmem>>, vector<1x1x16xf32>
    %102 = vector.shape_cast %101 : vector<1x1x16xf32> to vector<1x16xf32>
    %103 = vector.broadcast %102 : vector<1x16xf32> to vector<48x16xf32>
    %104 = arith.addf %100, %103 : vector<48x16xf32>
    %c3 = arith.constant 3 : index
    %c0_71 = arith.constant 0 : index
    %c0_72 = arith.constant 0 : index
    %105 = vector.load %arg9[%c3, %c0_71, %c0_72] : memref<4x16x16xbf16, #tpu.memory_space<vmem>>, vector<1x16x16xbf16>
    %106 = vector.shape_cast %105 : vector<1x16x16xbf16> to vector<16x16xbf16>
    %cst_73 = arith.constant dense<0.000000e+00> : vector<48x16xf32>
    %107 = tpu.matmul %83, %106, %cst_73 {dimension_numbers = #tpu.dot_dimension_numbers<[1], [0], [0], [1], [0, 0, 1, 1], [], []>} : vector<48x16xbf16>, vector<16x16xbf16>, vector<48x16xf32> -> vector<48x16xf32>
    %c3_74 = arith.constant 3 : index
    %c0_75 = arith.constant 0 : index
    %c0_76 = arith.constant 0 : index
    %108 = vector.load %arg11[%c3_74, %c0_75, %c0_76] : memref<4x1x16xf32, #tpu.memory_space<vmem>>, vector<1x1x16xf32>
    %109 = vector.shape_cast %108 : vector<1x1x16xf32> to vector<1x16xf32>
    %110 = vector.broadcast %109 : vector<1x16xf32> to vector<48x16xf32>
    %111 = arith.addf %107, %110 : vector<48x16xf32>
    %cst_77 = arith.constant 0.000000e+00 : f32
    %112 = vector.broadcast %cst_77 : f32 to vector<16x16xf32>
    %cst_78 = arith.constant 0.000000e+00 : f32
    %113 = vector.broadcast %cst_78 : f32 to vector<16x16xf32>
    %114 = arith.truncf %112 : vector<16x16xf32> to vector<16x16xbf16>
    %115 = vector.extract_strided_slice %90 {offsets = [0, 0], sizes = [16, 16], strides = [1, 1]} : vector<48x16xf32> to vector<16x16xf32>
    %c0_79 = arith.constant 0 : index
    %c0_80 = arith.constant 0 : index
    %c0_81 = arith.constant 0 : index
    %116 = vector.load %arg10[%c0_79, %c0_80, %c0_81] : memref<4x16x16xbf16, #tpu.memory_space<vmem>>, vector<1x16x16xbf16>
    %117 = vector.shape_cast %116 : vector<1x16x16xbf16> to vector<16x16xbf16>
    %cst_82 = arith.constant dense<0.000000e+00> : vector<16x16xf32>
    %118 = tpu.matmul %114, %117, %cst_82 {dimension_numbers = #tpu.dot_dimension_numbers<[1], [0], [0], [1], [0, 0, 1, 1], [], []>} : vector<16x16xbf16>, vector<16x16xbf16>, vector<16x16xf32> -> vector<16x16xf32>
    %119 = arith.addf %115, %118 : vector<16x16xf32>
    %120 = vector.extract_strided_slice %97 {offsets = [0, 0], sizes = [16, 16], strides = [1, 1]} : vector<48x16xf32> to vector<16x16xf32>
    %c1_83 = arith.constant 1 : index
    %c0_84 = arith.constant 0 : index
    %c0_85 = arith.constant 0 : index
    %121 = vector.load %arg10[%c1_83, %c0_84, %c0_85] : memref<4x16x16xbf16, #tpu.memory_space<vmem>>, vector<1x16x16xbf16>
    %122 = vector.shape_cast %121 : vector<1x16x16xbf16> to vector<16x16xbf16>
    %cst_86 = arith.constant dense<0.000000e+00> : vector<16x16xf32>
    %123 = tpu.matmul %114, %122, %cst_86 {dimension_numbers = #tpu.dot_dimension_numbers<[1], [0], [0], [1], [0, 0, 1, 1], [], []>} : vector<16x16xbf16>, vector<16x16xbf16>, vector<16x16xf32> -> vector<16x16xf32>
    %124 = arith.addf %120, %123 : vector<16x16xf32>
    %125 = vector.extract_strided_slice %104 {offsets = [0, 0], sizes = [16, 16], strides = [1, 1]} : vector<48x16xf32> to vector<16x16xf32>
    %c2_87 = arith.constant 2 : index
    %c0_88 = arith.constant 0 : index
    %c0_89 = arith.constant 0 : index
    %126 = vector.load %arg10[%c2_87, %c0_88, %c0_89] : memref<4x16x16xbf16, #tpu.memory_space<vmem>>, vector<1x16x16xbf16>
    %127 = vector.shape_cast %126 : vector<1x16x16xbf16> to vector<16x16xbf16>
    %cst_90 = arith.constant dense<0.000000e+00> : vector<16x16xf32>
    %128 = tpu.matmul %114, %127, %cst_90 {dimension_numbers = #tpu.dot_dimension_numbers<[1], [0], [0], [1], [0, 0, 1, 1], [], []>} : vector<16x16xbf16>, vector<16x16xbf16>, vector<16x16xf32> -> vector<16x16xf32>
    %129 = arith.addf %125, %128 : vector<16x16xf32>
    %130 = vector.extract_strided_slice %111 {offsets = [0, 0], sizes = [16, 16], strides = [1, 1]} : vector<48x16xf32> to vector<16x16xf32>
    %c3_91 = arith.constant 3 : index
    %c0_92 = arith.constant 0 : index
    %c0_93 = arith.constant 0 : index
    %131 = vector.load %arg10[%c3_91, %c0_92, %c0_93] : memref<4x16x16xbf16, #tpu.memory_space<vmem>>, vector<1x16x16xbf16>
    %132 = vector.shape_cast %131 : vector<1x16x16xbf16> to vector<16x16xbf16>
    %cst_94 = arith.constant dense<0.000000e+00> : vector<16x16xf32>
    %133 = tpu.matmul %114, %132, %cst_94 {dimension_numbers = #tpu.dot_dimension_numbers<[1], [0], [0], [1], [0, 0, 1, 1], [], []>} : vector<16x16xbf16>, vector<16x16xbf16>, vector<16x16xf32> -> vector<16x16xf32>
    %134 = arith.addf %130, %133 : vector<16x16xf32>
    %cst_95 = arith.constant 0.000000e+00 : f32
    %135 = vector.broadcast %cst_95 : f32 to vector<16x16xf32>
    %136 = arith.subf %135, %119 : vector<16x16xf32>
    %137 = math.exp %136 : vector<16x16xf32>
    %cst_96 = arith.constant 1.000000e+00 : f32
    %138 = vector.broadcast %cst_96 : f32 to vector<16x16xf32>
    %139 = arith.addf %138, %137 : vector<16x16xf32>
    %cst_97 = arith.constant 1.000000e+00 : f32
    %140 = vector.broadcast %cst_97 : f32 to vector<16x16xf32>
    %141 = arith.divf %140, %139 : vector<16x16xf32>
    %cst_98 = arith.constant 0.000000e+00 : f32
    %142 = vector.broadcast %cst_98 : f32 to vector<16x16xf32>
    %143 = arith.subf %142, %124 : vector<16x16xf32>
    %144 = math.exp %143 : vector<16x16xf32>
    %cst_99 = arith.constant 1.000000e+00 : f32
    %145 = vector.broadcast %cst_99 : f32 to vector<16x16xf32>
    %146 = arith.addf %145, %144 : vector<16x16xf32>
    %cst_100 = arith.constant 1.000000e+00 : f32
    %147 = vector.broadcast %cst_100 : f32 to vector<16x16xf32>
    %148 = arith.divf %147, %146 : vector<16x16xf32>
    %149 = math.tanh %129 : vector<16x16xf32>
    %cst_101 = arith.constant 0.000000e+00 : f32
    %150 = vector.broadcast %cst_101 : f32 to vector<16x16xf32>
    %151 = arith.subf %150, %134 : vector<16x16xf32>
    %152 = math.exp %151 : vector<16x16xf32>
    %cst_102 = arith.constant 1.000000e+00 : f32
    %153 = vector.broadcast %cst_102 : f32 to vector<16x16xf32>
    %154 = arith.addf %153, %152 : vector<16x16xf32>
    %cst_103 = arith.constant 1.000000e+00 : f32
    %155 = vector.broadcast %cst_103 : f32 to vector<16x16xf32>
    %156 = arith.divf %155, %154 : vector<16x16xf32>
    %157 = arith.mulf %148, %113 : vector<16x16xf32>
    %158 = arith.mulf %141, %149 : vector<16x16xf32>
    %159 = arith.addf %157, %158 : vector<16x16xf32>
    %160 = math.tanh %159 : vector<16x16xf32>
    %161 = arith.mulf %156, %160 : vector<16x16xf32>
    %162 = arith.truncf %161 : vector<16x16xf32> to vector<16x16xbf16>
    %163 = vector.extract_strided_slice %90 {offsets = [16, 0], sizes = [16, 16], strides = [1, 1]} : vector<48x16xf32> to vector<16x16xf32>
    %c0_104 = arith.constant 0 : index
    %c0_105 = arith.constant 0 : index
    %c0_106 = arith.constant 0 : index
    %164 = vector.load %arg10[%c0_104, %c0_105, %c0_106] : memref<4x16x16xbf16, #tpu.memory_space<vmem>>, vector<1x16x16xbf16>
    %165 = vector.shape_cast %164 : vector<1x16x16xbf16> to vector<16x16xbf16>
    %cst_107 = arith.constant dense<0.000000e+00> : vector<16x16xf32>
    %166 = tpu.matmul %162, %165, %cst_107 {dimension_numbers = #tpu.dot_dimension_numbers<[1], [0], [0], [1], [0, 0, 1, 1], [], []>} : vector<16x16xbf16>, vector<16x16xbf16>, vector<16x16xf32> -> vector<16x16xf32>
    %167 = arith.addf %163, %166 : vector<16x16xf32>
    %168 = vector.extract_strided_slice %97 {offsets = [16, 0], sizes = [16, 16], strides = [1, 1]} : vector<48x16xf32> to vector<16x16xf32>
    %c1_108 = arith.constant 1 : index
    %c0_109 = arith.constant 0 : index
    %c0_110 = arith.constant 0 : index
    %169 = vector.load %arg10[%c1_108, %c0_109, %c0_110] : memref<4x16x16xbf16, #tpu.memory_space<vmem>>, vector<1x16x16xbf16>
    %170 = vector.shape_cast %169 : vector<1x16x16xbf16> to vector<16x16xbf16>
    %cst_111 = arith.constant dense<0.000000e+00> : vector<16x16xf32>
    %171 = tpu.matmul %162, %170, %cst_111 {dimension_numbers = #tpu.dot_dimension_numbers<[1], [0], [0], [1], [0, 0, 1, 1], [], []>} : vector<16x16xbf16>, vector<16x16xbf16>, vector<16x16xf32> -> vector<16x16xf32>
    %172 = arith.addf %168, %171 : vector<16x16xf32>
    %173 = vector.extract_strided_slice %104 {offsets = [16, 0], sizes = [16, 16], strides = [1, 1]} : vector<48x16xf32> to vector<16x16xf32>
    %c2_112 = arith.constant 2 : index
    %c0_113 = arith.constant 0 : index
    %c0_114 = arith.constant 0 : index
    %174 = vector.load %arg10[%c2_112, %c0_113, %c0_114] : memref<4x16x16xbf16, #tpu.memory_space<vmem>>, vector<1x16x16xbf16>
    %175 = vector.shape_cast %174 : vector<1x16x16xbf16> to vector<16x16xbf16>
    %cst_115 = arith.constant dense<0.000000e+00> : vector<16x16xf32>
    %176 = tpu.matmul %162, %175, %cst_115 {dimension_numbers = #tpu.dot_dimension_numbers<[1], [0], [0], [1], [0, 0, 1, 1], [], []>} : vector<16x16xbf16>, vector<16x16xbf16>, vector<16x16xf32> -> vector<16x16xf32>
    %177 = arith.addf %173, %176 : vector<16x16xf32>
    %178 = vector.extract_strided_slice %111 {offsets = [16, 0], sizes = [16, 16], strides = [1, 1]} : vector<48x16xf32> to vector<16x16xf32>
    %c3_116 = arith.constant 3 : index
    %c0_117 = arith.constant 0 : index
    %c0_118 = arith.constant 0 : index
    %179 = vector.load %arg10[%c3_116, %c0_117, %c0_118] : memref<4x16x16xbf16, #tpu.memory_space<vmem>>, vector<1x16x16xbf16>
    %180 = vector.shape_cast %179 : vector<1x16x16xbf16> to vector<16x16xbf16>
    %cst_119 = arith.constant dense<0.000000e+00> : vector<16x16xf32>
    %181 = tpu.matmul %162, %180, %cst_119 {dimension_numbers = #tpu.dot_dimension_numbers<[1], [0], [0], [1], [0, 0, 1, 1], [], []>} : vector<16x16xbf16>, vector<16x16xbf16>, vector<16x16xf32> -> vector<16x16xf32>
    %182 = arith.addf %178, %181 : vector<16x16xf32>
    %cst_120 = arith.constant 0.000000e+00 : f32
    %183 = vector.broadcast %cst_120 : f32 to vector<16x16xf32>
    %184 = arith.subf %183, %167 : vector<16x16xf32>
    %185 = math.exp %184 : vector<16x16xf32>
    %cst_121 = arith.constant 1.000000e+00 : f32
    %186 = vector.broadcast %cst_121 : f32 to vector<16x16xf32>
    %187 = arith.addf %186, %185 : vector<16x16xf32>
    %cst_122 = arith.constant 1.000000e+00 : f32
    %188 = vector.broadcast %cst_122 : f32 to vector<16x16xf32>
    %189 = arith.divf %188, %187 : vector<16x16xf32>
    %cst_123 = arith.constant 0.000000e+00 : f32
    %190 = vector.broadcast %cst_123 : f32 to vector<16x16xf32>
    %191 = arith.subf %190, %172 : vector<16x16xf32>
    %192 = math.exp %191 : vector<16x16xf32>
    %cst_124 = arith.constant 1.000000e+00 : f32
    %193 = vector.broadcast %cst_124 : f32 to vector<16x16xf32>
    %194 = arith.addf %193, %192 : vector<16x16xf32>
    %cst_125 = arith.constant 1.000000e+00 : f32
    %195 = vector.broadcast %cst_125 : f32 to vector<16x16xf32>
    %196 = arith.divf %195, %194 : vector<16x16xf32>
    %197 = math.tanh %177 : vector<16x16xf32>
    %cst_126 = arith.constant 0.000000e+00 : f32
    %198 = vector.broadcast %cst_126 : f32 to vector<16x16xf32>
    %199 = arith.subf %198, %182 : vector<16x16xf32>
    %200 = math.exp %199 : vector<16x16xf32>
    %cst_127 = arith.constant 1.000000e+00 : f32
    %201 = vector.broadcast %cst_127 : f32 to vector<16x16xf32>
    %202 = arith.addf %201, %200 : vector<16x16xf32>
    %cst_128 = arith.constant 1.000000e+00 : f32
    %203 = vector.broadcast %cst_128 : f32 to vector<16x16xf32>
    %204 = arith.divf %203, %202 : vector<16x16xf32>
    %205 = arith.mulf %196, %159 : vector<16x16xf32>
    %206 = arith.mulf %189, %197 : vector<16x16xf32>
    %207 = arith.addf %205, %206 : vector<16x16xf32>
    %208 = math.tanh %207 : vector<16x16xf32>
    %209 = arith.mulf %204, %208 : vector<16x16xf32>
    %210 = arith.truncf %209 : vector<16x16xf32> to vector<16x16xbf16>
    %211 = vector.extract_strided_slice %90 {offsets = [32, 0], sizes = [16, 16], strides = [1, 1]} : vector<48x16xf32> to vector<16x16xf32>
    %c0_129 = arith.constant 0 : index
    %c0_130 = arith.constant 0 : index
    %c0_131 = arith.constant 0 : index
    %212 = vector.load %arg10[%c0_129, %c0_130, %c0_131] : memref<4x16x16xbf16, #tpu.memory_space<vmem>>, vector<1x16x16xbf16>
    %213 = vector.shape_cast %212 : vector<1x16x16xbf16> to vector<16x16xbf16>
    %cst_132 = arith.constant dense<0.000000e+00> : vector<16x16xf32>
    %214 = tpu.matmul %210, %213, %cst_132 {dimension_numbers = #tpu.dot_dimension_numbers<[1], [0], [0], [1], [0, 0, 1, 1], [], []>} : vector<16x16xbf16>, vector<16x16xbf16>, vector<16x16xf32> -> vector<16x16xf32>
    %215 = arith.addf %211, %214 : vector<16x16xf32>
    %216 = vector.extract_strided_slice %97 {offsets = [32, 0], sizes = [16, 16], strides = [1, 1]} : vector<48x16xf32> to vector<16x16xf32>
    %c1_133 = arith.constant 1 : index
    %c0_134 = arith.constant 0 : index
    %c0_135 = arith.constant 0 : index
    %217 = vector.load %arg10[%c1_133, %c0_134, %c0_135] : memref<4x16x16xbf16, #tpu.memory_space<vmem>>, vector<1x16x16xbf16>
    %218 = vector.shape_cast %217 : vector<1x16x16xbf16> to vector<16x16xbf16>
    %cst_136 = arith.constant dense<0.000000e+00> : vector<16x16xf32>
    %219 = tpu.matmul %210, %218, %cst_136 {dimension_numbers = #tpu.dot_dimension_numbers<[1], [0], [0], [1], [0, 0, 1, 1], [], []>} : vector<16x16xbf16>, vector<16x16xbf16>, vector<16x16xf32> -> vector<16x16xf32>
    %220 = arith.addf %216, %219 : vector<16x16xf32>
    %221 = vector.extract_strided_slice %104 {offsets = [32, 0], sizes = [16, 16], strides = [1, 1]} : vector<48x16xf32> to vector<16x16xf32>
    %c2_137 = arith.constant 2 : index
    %c0_138 = arith.constant 0 : index
    %c0_139 = arith.constant 0 : index
    %222 = vector.load %arg10[%c2_137, %c0_138, %c0_139] : memref<4x16x16xbf16, #tpu.memory_space<vmem>>, vector<1x16x16xbf16>
    %223 = vector.shape_cast %222 : vector<1x16x16xbf16> to vector<16x16xbf16>
    %cst_140 = arith.constant dense<0.000000e+00> : vector<16x16xf32>
    %224 = tpu.matmul %210, %223, %cst_140 {dimension_numbers = #tpu.dot_dimension_numbers<[1], [0], [0], [1], [0, 0, 1, 1], [], []>} : vector<16x16xbf16>, vector<16x16xbf16>, vector<16x16xf32> -> vector<16x16xf32>
    %225 = arith.addf %221, %224 : vector<16x16xf32>
    %226 = vector.extract_strided_slice %111 {offsets = [32, 0], sizes = [16, 16], strides = [1, 1]} : vector<48x16xf32> to vector<16x16xf32>
    %c3_141 = arith.constant 3 : index
    %c0_142 = arith.constant 0 : index
    %c0_143 = arith.constant 0 : index
    %227 = vector.load %arg10[%c3_141, %c0_142, %c0_143] : memref<4x16x16xbf16, #tpu.memory_space<vmem>>, vector<1x16x16xbf16>
    %228 = vector.shape_cast %227 : vector<1x16x16xbf16> to vector<16x16xbf16>
    %cst_144 = arith.constant dense<0.000000e+00> : vector<16x16xf32>
    %229 = tpu.matmul %210, %228, %cst_144 {dimension_numbers = #tpu.dot_dimension_numbers<[1], [0], [0], [1], [0, 0, 1, 1], [], []>} : vector<16x16xbf16>, vector<16x16xbf16>, vector<16x16xf32> -> vector<16x16xf32>
    %230 = arith.addf %226, %229 : vector<16x16xf32>
    %cst_145 = arith.constant 0.000000e+00 : f32
    %231 = vector.broadcast %cst_145 : f32 to vector<16x16xf32>
    %232 = arith.subf %231, %215 : vector<16x16xf32>
    %233 = math.exp %232 : vector<16x16xf32>
    %cst_146 = arith.constant 1.000000e+00 : f32
    %234 = vector.broadcast %cst_146 : f32 to vector<16x16xf32>
    %235 = arith.addf %234, %233 : vector<16x16xf32>
    %cst_147 = arith.constant 1.000000e+00 : f32
    %236 = vector.broadcast %cst_147 : f32 to vector<16x16xf32>
    %237 = arith.divf %236, %235 : vector<16x16xf32>
    %cst_148 = arith.constant 0.000000e+00 : f32
    %238 = vector.broadcast %cst_148 : f32 to vector<16x16xf32>
    %239 = arith.subf %238, %220 : vector<16x16xf32>
    %240 = math.exp %239 : vector<16x16xf32>
    %cst_149 = arith.constant 1.000000e+00 : f32
    %241 = vector.broadcast %cst_149 : f32 to vector<16x16xf32>
    %242 = arith.addf %241, %240 : vector<16x16xf32>
    %cst_150 = arith.constant 1.000000e+00 : f32
    %243 = vector.broadcast %cst_150 : f32 to vector<16x16xf32>
    %244 = arith.divf %243, %242 : vector<16x16xf32>
    %245 = math.tanh %225 : vector<16x16xf32>
    %cst_151 = arith.constant 0.000000e+00 : f32
    %246 = vector.broadcast %cst_151 : f32 to vector<16x16xf32>
    %247 = arith.subf %246, %230 : vector<16x16xf32>
    %248 = math.exp %247 : vector<16x16xf32>
    %cst_152 = arith.constant 1.000000e+00 : f32
    %249 = vector.broadcast %cst_152 : f32 to vector<16x16xf32>
    %250 = arith.addf %249, %248 : vector<16x16xf32>
    %cst_153 = arith.constant 1.000000e+00 : f32
    %251 = vector.broadcast %cst_153 : f32 to vector<16x16xf32>
    %252 = arith.divf %251, %250 : vector<16x16xf32>
    %253 = arith.mulf %244, %207 : vector<16x16xf32>
    %254 = arith.mulf %237, %245 : vector<16x16xf32>
    %255 = arith.addf %253, %254 : vector<16x16xf32>
    %256 = math.tanh %255 : vector<16x16xf32>
    %257 = arith.mulf %252, %256 : vector<16x16xf32>
    %258 = tpu.transpose %257, [1, 0] : vector<16x16xf32> -> vector<16x16xf32>
    %259 = arith.truncf %258 : vector<16x16xf32> to vector<16x16xbf16>
    %c0_154 = arith.constant 0 : index
    %c0_155 = arith.constant 0 : index
    %c0_156 = arith.constant 0 : index
    %260 = vector.load %arg12[%c0_154, %c0_155, %c0_156] : memref<2x16x32xbf16, #tpu.memory_space<vmem>>, vector<1x16x32xbf16>
    %261 = vector.shape_cast %260 : vector<1x16x32xbf16> to vector<16x32xbf16>
    %cst_157 = arith.constant dense<0.000000e+00> : vector<16x32xf32>
    %262 = tpu.matmul %259, %261, %cst_157 {dimension_numbers = #tpu.dot_dimension_numbers<[1], [0], [0], [1], [0, 0, 1, 1], [], []>} : vector<16x16xbf16>, vector<16x32xbf16>, vector<16x32xf32> -> vector<16x32xf32>
    %c0_158 = arith.constant 0 : index
    %c0_159 = arith.constant 0 : index
    %c0_160 = arith.constant 0 : index
    %263 = vector.load %arg13[%c0_158, %c0_159, %c0_160] : memref<2x16x32xbf16, #tpu.memory_space<vmem>>, vector<1x16x32xbf16>
    %264 = vector.shape_cast %263 : vector<1x16x32xbf16> to vector<16x32xbf16>
    %cst_161 = arith.constant dense<0.000000e+00> : vector<16x32xf32>
    %265 = tpu.matmul %259, %264, %cst_161 {dimension_numbers = #tpu.dot_dimension_numbers<[1], [0], [0], [1], [0, 0, 1, 1], [], []>} : vector<16x16xbf16>, vector<16x32xbf16>, vector<16x32xf32> -> vector<16x32xf32>
    %266 = arith.mulf %262, %265 : vector<16x32xf32>
    %cst_162 = arith.constant dense<0.000000e+00> : vector<32xf32>
    %267 = vector.multi_reduction <add>, %266, %cst_162 [0] : vector<16x32xf32> to vector<32xf32>
    %268 = vector.shape_cast %267 : vector<32xf32> to vector<1x32xf32>
    %c1_163 = arith.constant 1 : index
    %c0_164 = arith.constant 0 : index
    %c0_165 = arith.constant 0 : index
    %269 = vector.load %arg12[%c1_163, %c0_164, %c0_165] : memref<2x16x32xbf16, #tpu.memory_space<vmem>>, vector<1x16x32xbf16>
    %270 = vector.shape_cast %269 : vector<1x16x32xbf16> to vector<16x32xbf16>
    %cst_166 = arith.constant dense<0.000000e+00> : vector<16x32xf32>
    %271 = tpu.matmul %259, %270, %cst_166 {dimension_numbers = #tpu.dot_dimension_numbers<[1], [0], [0], [1], [0, 0, 1, 1], [], []>} : vector<16x16xbf16>, vector<16x32xbf16>, vector<16x32xf32> -> vector<16x32xf32>
    %c1_167 = arith.constant 1 : index
    %c0_168 = arith.constant 0 : index
    %c0_169 = arith.constant 0 : index
    %272 = vector.load %arg13[%c1_167, %c0_168, %c0_169] : memref<2x16x32xbf16, #tpu.memory_space<vmem>>, vector<1x16x32xbf16>
    %273 = vector.shape_cast %272 : vector<1x16x32xbf16> to vector<16x32xbf16>
    %cst_170 = arith.constant dense<0.000000e+00> : vector<16x32xf32>
    %274 = tpu.matmul %259, %273, %cst_170 {dimension_numbers = #tpu.dot_dimension_numbers<[1], [0], [0], [1], [0, 0, 1, 1], [], []>} : vector<16x16xbf16>, vector<16x32xbf16>, vector<16x32xf32> -> vector<16x32xf32>
    %275 = arith.mulf %271, %274 : vector<16x32xf32>
    %cst_171 = arith.constant dense<0.000000e+00> : vector<32xf32>
    %276 = vector.multi_reduction <add>, %275, %cst_171 [0] : vector<16x32xf32> to vector<32xf32>
    %277 = vector.shape_cast %276 : vector<32xf32> to vector<1x32xf32>
    %278 = tpu.concatenate %268, %277 in 0 : vector<1x32xf32>, vector<1x32xf32> -> vector<2x32xf32>
    %cst_172 = arith.constant 0.000000e+00 : f32
    %279 = vector.broadcast %cst_172 : f32 to vector<2x32xf32>
    %280 = arith.subf %279, %278 : vector<2x32xf32>
    %281 = math.exp %280 : vector<2x32xf32>
    %cst_173 = arith.constant 1.000000e+00 : f32
    %282 = vector.broadcast %cst_173 : f32 to vector<2x32xf32>
    %283 = arith.addf %282, %281 : vector<2x32xf32>
    %cst_174 = arith.constant 1.000000e+00 : f32
    %284 = vector.broadcast %cst_174 : f32 to vector<2x32xf32>
    %285 = arith.divf %284, %283 : vector<2x32xf32>
    %c0_175 = arith.constant 0 : index
    %c0_176 = arith.constant 0 : index
    %286 = vector.load %arg15[%c0_175, %c0_176] : memref<2x32xf32, #tpu.memory_space<vmem>>, vector<2x32xf32>
    tpu.vector_store %arg15[%c0_175, %c0_176], %285 {strides = array<i32>} : memref<2x32xf32, #tpu.memory_space<vmem>>, vector<2x32xf32>,
    return
  }
}

</mosaic_0001>

<bundles_post_ra>
// kernel: batch_model_forward.1
= control target key start
LH: loop header
LB: loop body
LE: loop exit
PB: predicated region body
PF: predicated region fallthrough
CT: control target
= control target key end

     0   :  { %21 = vsyncpa [#allocation3], 0  ;;  %s3817_s0 = inlined_call_operand.vmem [shape: bf16[3,32,64], index: 0, kind: input, shape index: {}]   ;;  %s3818_s1 = inlined_call_operand.vmem [shape: bf16[192,32], index: 1, kind: input, shape index: {}]   ;;  %s3819_s2 = inlined_call_operand.vmem [shape: bf16[3,16,32], index: 2, kind: input, shape index: {}]   ;;  %s3820_s3 = inlined_call_operand.hbm [shape: bf16[32,32], index: 3, kind: input, shape index: {}]   ;;  %s3821_s4 = inlined_call_operand.hbm [shape: bf16[32,32], index: 4, kind: input, shape index: {}]   ;;  %s3822_s5 = inlined_call_operand.vmem [shape: f32[1,32], index: 5, kind: input, shape index: {}]   ;;  %s3823_s6 = inlined_call_operand.vmem [shape: bf16[32,16], index: 6, kind: input, shape index: {}]   ;;  %s3824_s7 = inlined_call_operand.vmem [shape: bf16[32,16], index: 7, kind: input, shape index: {}]   ;;  %s3825_s8 = inlined_call_operand.vmem [shape: f32[1,16], index: 8, kind: input, shape index: {}]   ;;  %s3826_s9 = inlined_call_operand.vmem [shape: bf16[4,16,16], index: 9, kind: input, shape index: {}]   ;;  %s3827_s10 = inlined_call_operand.vmem [shape: bf16[4,16,16], index: 10, kind: input, shape index: {}]   ;;  %s3828_s11 = inlined_call_operand.vmem [shape: f32[4,1,16], index: 11, kind: input, shape index: {}]   ;;  %s3829_s12 = inlined_call_operand.vmem [shape: bf16[2,16,32], index: 12, kind: input, shape index: {}]   ;;  %s3830_s13 = inlined_call_operand.hbm [shape: bf16[2,16,32], index: 13, kind: input, shape index: {}]   ;;  %s3831_s14 = inlined_call_operand.hbm [shape: f32[3,16,16], index: 14, kind: output, shape index: {0}]   ;;  %s3832_s15 = inlined_call_operand.vmem [shape: f32[2,32], index: 15, kind: output, shape index: {1}]  }
   0x1   :  { %22 = vsyncpa [#allocation6], 0 }
   0x2   :  { %23 = vsyncpa [#allocation4], 0  ;;  %s3259_s18 = smov [#allocation5]   ;;  %s3260_s20 = smov [#allocation2]  }
   0x3   :  { %s47_s19 = sshll.u32 %s3259_s18, 4  ;;  %s35_s21 = sshll.u32 %s3260_s20, 4  ;;  %s48_s19 = int_to_ptr.vmem [resolvable:$true] %s47_s19  ;;  %s36_s21 = int_to_ptr.vmem [resolvable:$true] %s35_s21 }
   0x4   :  { %s3181_s22 = scalar_lea.vmem %s48_s19, 256  ;;  %p3186_p1 = scmp.lt.s32.totalorder %s48_s19, %s48_s19 }
   0x5   :  { %p3182_p0 = scmp.ne.s32.totalorder %s48_s19, %s3181_s22  ;;  %p3187_p2 = scmp.lt.s32.totalorder %s3181_s22, %s3181_s22 }
   0x7   :  { %p3188_p3 = por %p3187_p2, %p3186_p1 }
   0x9   :  { %p3189_p4 = pnand %p3188_p3, %p3182_p0 }
   0xb   :  { %3192 = shalt.err (!%p3189_p4)
}
   0xc   :  { %s3261_s23 = smov 64   ;;  %s3262_s24 = smov 4  }
   0xd   :  { %53 = dma.hbm_to_vmem [thread:$0]  %s3821_s4, 256, %s48_s19, [#allocation6], %s3261_s23, %s3261_s23, %s3262_s24  }
   0xe   :  { %s3201_s27 = scalar_lea.vmem %s36_s21, 256  ;;  %p3206_p6 = scmp.lt.s32.totalorder %s36_s21, %s36_s21 }
   0xf   :  { %p3202_p5 = scmp.ne.s32.totalorder %s36_s21, %s3201_s27  ;;  %p3207_p7 = scmp.lt.s32.totalorder %s3201_s27, %s3201_s27 }
  0x11   :  { %p3208_p8 = por %p3207_p7, %p3206_p6 }
  0x13   :  { %p3209_p9 = pnand %p3208_p8, %p3202_p5 }
  0x15   :  { %3212 = shalt.err (!%p3209_p9)
}
  0x16   :  { %41 = dma.hbm_to_vmem [thread:$0]  %s3820_s3, 256, %s36_s21, [#allocation3], %s3261_s23, %s3261_s23, %s3262_s24  }
  0x17   :  { %s3263_s30 = smov [#allocation7]  }
  0x18   :  { %s75_s16 = sshll.u32 %s3263_s30, 4  ;;  %s76_s16 = int_to_ptr.vmem [resolvable:$true] %s75_s16 }
  0x19   :  { %s3221_s17 = scalar_lea.vmem %s76_s16, 256  ;;  %p3226_p11 = scmp.lt.s32.totalorder %s76_s16, %s76_s16 }
  0x1a   :  { %p3222_p10 = scmp.ne.s32.totalorder %s76_s16, %s3221_s17  ;;  %p3227_p12 = scmp.lt.s32.totalorder %s3221_s17, %s3221_s17 }
  0x1c   :  { %p3228_p13 = por %p3227_p12, %p3226_p11 }
  0x1e   :  { %p3229_p0 = pnand %p3228_p13, %p3222_p10 }
  0x20   :  { %3232 = shalt.err (!%p3229_p0)
}
  0x21   :  { %81 = dma.hbm_to_vmem [thread:$0]  %s3830_s13, 256, %s76_s16, [#allocation6], %s3261_s23, %s3261_s23, %s3262_s24  }
  0x22   :  { %3253 = dma.done.wait [#allocation3], 256  }
  0x23   :  { %3254 = vsyncadd [#allocation3], 4294967040 }
  0x24   :  { %3255 = dma.done.wait [#allocation6], 512  }
  0x25   :  { %3256 = vsyncadd [#allocation6], 4294966784  ;;  %v3032_v0 = vld [vmem:[#allocation5 + $0x8] sm:$0xff]   ;;  %v3033_v1 = vld [vmem:[#allocation5] sm:$0xff]   ;;  %vm194_vm0 = vcmask 261120   ;;  %vm519_vm1 = vcmask 523264  }
  0x26   :  { %2749 = vmatprep.subr.bf16.mxu1 %v3032_v0  ;;  %v3034_v2 = vld [vmem:[%s3818_s1] sm:$0xff]   ;;  %v3035_v3 = vld [vmem:[%s3818_s1 + $0x8] sm:$0xff]   ;;  %v3036_v4 = vld [vmem:[%s3818_s1 + $0x10] sm:$0xff]   ;;  %vm3265_vm2 = vmmov 0   ;;  %vm1036_vm3 = vcmask 130048   ;;  %s3267_s29 = smov [#allocation8]  }
  0x27   :  { %2750 = vmatpush3.bf16.msra.mxu1 %v3032_v0  ;;  %2753 = vmatprep.mubr.msk.bf16.mxu1 %vm194_vm0, %v3034_v2  ;;  %v3037_v5 = vld [vmem:[%s3818_s1 + $0x18] sm:$0xff]   ;;  %v3038_v6 = vld [vmem:[%s3818_s1 + $0x20] sm:$0xff]   ;;  %v3046_v7 = vld [vmem:[#allocation2 + $0x8] sm:$0xff]  }
  0x28   :  { %2751 = vmatprep.subr.bf16.mxu1 %v3033_v1  ;;  %2725 = vmatprep.mubr.msk.bf16.mxu0 %vm194_vm0, %v3034_v2  ;;  %v3047_v8 = vld [vmem:[#allocation2] sm:$0xff]   ;;  %v3039_v9 = vld [vmem:[%s3818_s1 + $0x28] sm:$0xff]   ;;  %v3040_v10 = vld [vmem:[%s3818_s1 + $0x30] sm:$0xff]  }
  0x29   :  { %2721 = vmatprep.subr.bf16.mxu0 %v3046_v7  ;;  %v3041_v11 = vld [vmem:[%s3818_s1 + $0x38] sm:$0xff]   ;;  %v3042_v12 = vld [vmem:[%s3818_s1 + $0x40] sm:$0xff]   ;;  %v3043_v13 = vld [vmem:[%s3818_s1 + $0x48] sm:$0xff]  }
  0x2a   :  { %2722 = vmatpush3.bf16.msra.mxu0 %v3046_v7  ;;  %v3044_v14 = vld [vmem:[%s3818_s1 + $0x50] sm:$0xff]   ;;  %v3045_v15 = vld [vmem:[%s3818_s1 + $0x58] sm:$0xff]   ;;  %v3048_v16 = vld [vmem:[%s3817_s0] sm:$0xff]  }
  0x2b   :  { %2752 = vmatpush3.bf16.msra.mxu1 %v3033_v1  ;;  %2723 = vmatprep.subr.bf16.mxu0 %v3047_v8  ;;  %v3050_v17 = vld [vmem:[%s3817_s0 + $0x10] sm:$0xff]   ;;  %v3049_v43 = vld [vmem:[%s3817_s0 + $0x8] sm:$0xff]   ;;  %v3052_v45 = vld [vmem:[%s3817_s0 + $0x20] sm:$0xff]  }
  0x2c   :  { %v3051_v1 = vld [vmem:[%s3817_s0 + $0x18] sm:$0xff]  }
  0x2e   :  { %2754 = vmatmul.mubr.msk.bf16.vlgmr.msra.gmra.mxu1 %vm194_vm0, %v3035_v3  ;;  %2724 = vmatpush3.bf16.msra.mxu0 %v3047_v8 }
  0x2f   :  { %2757 = vmatprep.mubr.msk.bf16.mxu1 %vm194_vm0, %v3036_v4 }
  0x31   :  { %2726 = vmatmul.mubr.msk.bf16.vlgmr.msra.gmra.mxu0 %vm194_vm0, %v3035_v3 }
  0x32   :  { %2729 = vmatprep.mubr.msk.bf16.mxu0 %vm194_vm0, %v3036_v4 }
  0x36   :  { %2758 = vmatmul.mubr.msk.bf16.gmra.mxu1 %vm194_vm0, %v3037_v5 }
  0x37   :  { %2761 = vmatprep.mubr.msk.bf16.mxu1 %vm194_vm0, %v3038_v6 }
  0x39   :  { %2730 = vmatmul.mubr.msk.bf16.gmra.mxu0 %vm194_vm0, %v3037_v5 }
  0x3a   :  { %2733 = vmatprep.mubr.msk.bf16.mxu0 %vm194_vm0, %v3038_v6 }
  0x3e   :  { %2762 = vmatmul.mubr.msk.bf16.gmra.mxu1 %vm194_vm0, %v3039_v9 }
  0x3f   :  { %2765 = vmatprep.mubr.msk.bf16.mxu1 %vm194_vm0, %v3040_v10 }
  0x41   :  { %2734 = vmatmul.mubr.msk.bf16.gmra.mxu0 %vm194_vm0, %v3039_v9 }
  0x42   :  { %2737 = vmatprep.mubr.msk.bf16.mxu0 %vm194_vm0, %v3040_v10 }
  0x46   :  { %2766 = vmatmul.mubr.msk.bf16.gmra.mxu1 %vm194_vm0, %v3041_v11 }
  0x47   :  { %2769 = vmatprep.mubr.msk.bf16.mxu1 %vm194_vm0, %v3042_v12 }
  0x49   :  { %2738 = vmatmul.mubr.msk.bf16.gmra.mxu0 %vm194_vm0, %v3041_v11 }
  0x4a   :  { %2741 = vmatprep.mubr.msk.bf16.mxu0 %vm194_vm0, %v3042_v12 }
  0x4e   :  { %2770 = vmatmul.mubr.msk.bf16.gmra.mxu1 %vm194_vm0, %v3043_v13 }
  0x4f   :  { %2773 = vmatprep.mubr.msk.bf16.mxu1 %vm194_vm0, %v3044_v14 }
  0x51   :  { %2742 = vmatmul.mubr.msk.bf16.gmra.mxu0 %vm194_vm0, %v3043_v13 }
  0x52   :  { %2745 = vmatprep.mubr.msk.bf16.mxu0 %vm194_vm0, %v3044_v14 }
  0x56   :  { %2774 = vmatmul.mubr.msk.bf16.gmra.mxu1 %vm194_vm0, %v3045_v15 }
  0x57   :  { %2797 = vmatprep.mubr.msk.bf16.mxu1 %vm519_vm1, %v3050_v17 }
  0x59   :  { %2746 = vmatmul.mubr.msk.bf16.gmra.mxu0 %vm194_vm0, %v3045_v15 }
  0x5a   :  { %2785 = vmatprep.mubr.msk.bf16.mxu0 %vm519_vm1, %v3048_v16  ;;  %v3053_v16 = vld [vmem:[%s3817_s0 + $0x28] sm:$0xff]  }
  0xee   :  { %v2755_v18 = vpop.f32.mrf.mxu1 }
  0xf0   :  { %v398_v19 = vpop.f32.mrf.mxu1 }
  0xf1   :  { %v3427_v27 = vpop.f32.mrf.mxu0 }
  0xf2   :  { %v2756_v20 = vpop.f32.mrf.mxu1 }
  0xf3   :  { %v3429_v30 = vpop.f32.mrf.mxu0  ;;  %v494_v33 = vpack.c.bf16 %v2756_v20, %v2755_v18  ;;  %v3054_v18 = vld [vmem:[%s3823_s6 + $0x8] sm:$0xff]   ;;  %v3056_v20 = vld [vmem:[%s3823_s6] sm:$0xff]  }
  0xf4   :  { %v401_v21 = vpop.f32.mrf.mxu1 }
  0xf5   :  { %v3431_v32 = vpop.f32.mrf.mxu0  ;;  %v493_v38 = vpack.c.bf16 %v401_v21, %v398_v19  ;;  %v3055_v19 = vld [vmem:[%s3824_s7 + $0x8] sm:$0xff]   ;;  %v3057_v21 = vld [vmem:[%s3824_s7] sm:$0xff]  }
  0xf6   :  { %v2759_v22 = vpop.f32.mrf.mxu1 }
  0xf7   :  { %v3433_v35 = vpop.f32.mrf.mxu0 }
  0xf8   :  { %v414_v23 = vpop.f32.mrf.mxu1 }
  0xf9   :  { %v2731_v37 = vpop.f32.mrf.mxu0 }
  0xfa   :  { %v2760_v24 = vpop.f32.mrf.mxu1 }
  0xfb   :  { %v496_v25 = vpack.c.bf16 %v2760_v24, %v2759_v22  ;;  %v281_v40 = vpop.f32.mrf.mxu0 }
  0xfc   :  { %v417_v26 = vpop.f32.mrf.mxu1 }
  0xfd   :  { %v495_v28 = vpack.c.bf16 %v417_v26, %v414_v23  ;;  %2777 = vmatprep.subr.bf16.mxu0 %v496_v25  ;;  %v2732_v42 = vpop.f32.mrf.mxu0 }
  0xfe   :  { %v2763_v29 = vpop.f32.mrf.mxu1  ;;  %2778 = vmatpush3.bf16.msra.mxu0 %v496_v25 }
  0xff   :  { %2779 = vmatprep.subr.bf16.mxu0 %v495_v28  ;;  %v283_v46 = vpop.f32.mrf.mxu0 }
 0x100   :  { %v430_v31 = vpop.f32.mrf.mxu1 }
 0x101   :  { %v3441_v49 = vpop.f32.mrf.mxu0 }
 0x102   :  { %v2764_v34 = vpop.f32.mrf.mxu1  ;;  %2780 = vmatpush3.bf16.msra.mxu0 %v495_v28  ;;  %v2501_v28 = vld [vmem:[%s3822_s5] ss:$0 sm:$0xff] }
 0x103   :  { %2781 = vmatprep.subr.bf16.mxu0 %v494_v33  ;;  %v3445_v52 = vpop.f32.mrf.mxu0  ;;  %v498_v55 = vpack.c.bf16 %v2764_v34, %v2763_v29 }
 0x104   :  { %v433_v36 = vpop.f32.mrf.mxu1 }
 0x105   :  { %v3447_v54 = vpop.f32.mrf.mxu0  ;;  %v497_v60 = vpack.c.bf16 %v433_v36, %v430_v31 }
 0x106   :  { %v2767_v39 = vpop.f32.mrf.mxu1  ;;  %2782 = vmatpush3.bf16.msra.mxu0 %v494_v33 }
 0x107   :  { %2783 = vmatprep.subr.bf16.mxu0 %v493_v38  ;;  %v3449_v57 = vpop.f32.mrf.mxu0 }
 0x108   :  { %v446_v41 = vpop.f32.mrf.mxu1 }
 0x109   :  { %v2739_v59 = vpop.f32.mrf.mxu0 }
 0x10a   :  { %v2768_v44 = vpop.f32.mrf.mxu1  ;;  %2784 = vmatpush3.bf16.msra.mxu0 %v493_v38 }
 0x10b   :  { %v500_v47 = vpack.c.bf16 %v2768_v44, %v2767_v39  ;;  %v309_v62 = vpop.f32.mrf.mxu0 }
 0x10c   :  { %v449_v48 = vpop.f32.mrf.mxu1 }
 0x10d   :  { %v499_v50 = vpack.c.bf16 %v449_v48, %v446_v41  ;;  %2786 = vmatmul.mubr.msk.bf16.vlgmr.msra.gmra.mxu0 %vm519_vm1, %v3049_v43  ;;  %2789 = vmatprep.subr.bf16.mxu1 %v500_v47  ;;  %v2740_v0 = vpop.f32.mrf.mxu0 }
 0x10e   :  { %v2771_v51 = vpop.f32.mrf.mxu1  ;;  %2790 = vmatpush3.bf16.msra.mxu1 %v500_v47  ;;  %2809 = vmatprep.mubr.msk.bf16.mxu0 %vm519_vm1, %v3052_v45 }
 0x10f   :  { %2791 = vmatprep.subr.bf16.mxu1 %v499_v50  ;;  %v311_v3 = vpop.f32.mrf.mxu0 }
 0x110   :  { %v462_v53 = vpop.f32.mrf.mxu1 }
 0x111   :  { %v3454_v6 = vpop.f32.mrf.mxu0 }
 0x112   :  { %v2772_v56 = vpop.f32.mrf.mxu1  ;;  %2792 = vmatpush3.bf16.msra.mxu1 %v499_v50 }
 0x113   :  { %2793 = vmatprep.subr.bf16.mxu1 %v498_v55  ;;  %v3457_v8 = vpop.f32.mrf.mxu0  ;;  %v502_v10 = vpack.c.bf16 %v2772_v56, %v2771_v51 }
 0x114   :  { %v465_v58 = vpop.f32.mrf.mxu1 }
 0x115   :  { %v3459_v9 = vpop.f32.mrf.mxu0  ;;  %v501_v13 = vpack.c.bf16 %v465_v58, %v462_v53 }
 0x116   :  { %v2775_v61 = vpop.f32.mrf.mxu1  ;;  %2794 = vmatpush3.bf16.msra.mxu1 %v498_v55 }
 0x117   :  { %2795 = vmatprep.subr.bf16.mxu1 %v497_v60  ;;  %v3461_v11 = vpop.f32.mrf.mxu0 }
 0x118   :  { %v478_v63 = vpop.f32.mrf.mxu1 }
 0x119   :  { %v2747_v12 = vpop.f32.mrf.mxu0 }
 0x11a   :  { %v2776_v2 = vpop.f32.mrf.mxu1  ;;  %2796 = vmatpush3.bf16.msra.mxu1 %v497_v60 }
 0x11b   :  { %v504_v4 = vpack.c.bf16 %v2776_v2, %v2775_v61  ;;  %v337_v14 = vpop.f32.mrf.mxu0  ;;  %2813 = vmatprep.subr.bf16.mxu1 %v3054_v18 }
 0x11c   :  { %v481_v5 = vpop.f32.mrf.mxu1 }
 0x11d   :  { %2798 = vmatmul.mubr.msk.bf16.vlgmr.msra.gmra.mxu1 %vm519_vm1, %v3051_v1  ;;  %2801 = vmatprep.subr.bf16.mxu0 %v504_v4  ;;  %v503_v7 = vpack.c.bf16 %v481_v5, %v478_v63  ;;  %v2748_v15 = vpop.f32.mrf.mxu0 }
 0x11e   :  { %2802 = vmatpush3.bf16.msra.mxu0 %v504_v4  ;;  %2814 = vmatpush3.bf16.msra.mxu1 %v3054_v18 }
 0x11f   :  { %2803 = vmatprep.subr.bf16.mxu0 %v503_v7  ;;  %v339_v17 = vpop.f32.mrf.mxu0  ;;  %2815 = vmatprep.subr.bf16.mxu1 %v3056_v20 }
 0x122   :  { %2804 = vmatpush3.bf16.msra.mxu0 %v503_v7  ;;  %2816 = vmatpush3.bf16.msra.mxu1 %v3056_v20 }
 0x123   :  { %2805 = vmatprep.subr.bf16.mxu0 %v502_v10 }
 0x126   :  { %2806 = vmatpush3.bf16.msra.mxu0 %v502_v10 }
 0x127   :  { %2807 = vmatprep.subr.bf16.mxu0 %v501_v13 }
 0x12a   :  { %2808 = vmatpush3.bf16.msra.mxu0 %v501_v13 }
 0x12b   :  { %2829 = vmatprep.subr.bf16.mxu0 %v3055_v19 }
 0x12d   :  { %2810 = vmatmul.mubr.msk.bf16.vlgmr.msra.gmra.mxu0 %vm519_vm1, %v3053_v16 }
 0x12e   :  { %2830 = vmatpush3.bf16.msra.mxu0 %v3055_v19 }
 0x12f   :  { %2831 = vmatprep.subr.bf16.mxu0 %v3057_v21 }
 0x132   :  { %2832 = vmatpush3.bf16.msra.mxu0 %v3057_v21 }
 0x1cd   :  { %v2787_v22 = vpop.f32.mrf.mxu0 }
 0x1ce   :  { %v577_v25 = vadd.f32 %v2787_v22, %v3427_v27 }
 0x1cf   :  { %v560_v23 = vpop.f32.mrf.mxu0 }
 0x1d0   :  { %v575_v24 = vadd.f32 %v560_v23, %v3429_v30  ;;  %v587_v37 = vadd.f32 %v2501_v28, %v577_v25  ;;  %v3058_v23 = vld [vmem:[%s3819_s2] sm:$0xff]  }
 0x1d1   :  { %v2788_v26 = vpop.f32.mrf.mxu0 }
 0x1d2   :  { %v578_v29 = vadd.f32 %v2788_v26, %v3431_v32  ;;  %v585_v33 = vadd.f32 %v2501_v28, %v575_v24  ;;  %v591_v30 = vmax.f32 %v587_v37, 0.0 }
 0x1d3   :  { %v563_v31 = vpop.f32.mrf.mxu0 }
 0x1d4   :  { %v588_v34 = vadd.f32 %v2501_v28, %v578_v29  ;;  %v576_v36 = vadd.f32 %v563_v31, %v3433_v35  ;;  %v589_v40 = vmax.f32 %v585_v33, 0.0 }
 0x1d6   :  { %v586_v38 = vadd.f32 %v2501_v28, %v576_v36  ;;  %v592_v39 = vmax.f32 %v588_v34, 0.0 }
 0x1d8   :  { %v590_v41 = vmax.f32 %v586_v38, 0.0  ;;  %v594_v27 = vpack.c.bf16 %v592_v39, %v591_v30  ;;  %v3059_v38 = vld [vmem:[%s3819_s2 + $0x8] sm:$0xff]  }
 0x1da   :  { %v593_v42 = vpack.c.bf16 %v590_v41, %v589_v40 }
 0x1dc   :  { %2817 = vmatprep.mubr.msk.bf16.mxu1 %vm194_vm0, %v593_v42  ;;  %2833 = vmatprep.mubr.msk.bf16.mxu0 %vm194_vm0, %v593_v42 }
 0x1dd   :  { %v2799_v43 = vpop.f32.mrf.mxu1  ;;  %2818 = vmatmul.mubr.msk.bf16.vlgmr.msra.gmra.mxu1 %vm194_vm0, %v594_v27  ;;  %2834 = vmatmul.mubr.msk.bf16.vlgmr.msra.gmra.mxu0 %vm194_vm0, %v594_v27 }
 0x1de   :  { %v667_v44 = vadd.f32 %v2799_v43, %v3441_v49 }
 0x1df   :  { %v650_v32 = vpop.f32.mrf.mxu1 }
 0x1e0   :  { %v665_v35 = vadd.f32 %v650_v32, %v3445_v52  ;;  %v671_v53 = vadd.f32 %v2501_v28, %v667_v44 }
 0x1e1   :  { %v2800_v45 = vpop.f32.mrf.mxu1 }
 0x1e2   :  { %v668_v46 = vadd.f32 %v2800_v45, %v3447_v54  ;;  %v669_v48 = vadd.f32 %v2501_v28, %v665_v35  ;;  %v675_v60 = vmax.f32 %v671_v53, 0.0  ;;  %v3060_v45 = vld [vmem:[%s3819_s2 + $0x10] sm:$0xff]  }
 0x1e3   :  { %v653_v47 = vpop.f32.mrf.mxu1 }
 0x1e4   :  { %v672_v50 = vadd.f32 %v2501_v28, %v668_v46  ;;  %v666_v51 = vadd.f32 %v653_v47, %v3449_v57  ;;  %v673_v58 = vmax.f32 %v669_v48, 0.0  ;;  %v3061_v46 = vld [vmem:[%s3826_s9] sm:$0xff]   ;;  %v3062_v47 = vld [vmem:[%s3826_s9 + $0x8] sm:$0xff]  }
 0x1e6   :  { %v670_v55 = vadd.f32 %v2501_v28, %v666_v51  ;;  %v676_v56 = vmax.f32 %v672_v50, 0.0  ;;  %v2536_v50 = vld [vmem:[%s3825_s8] ss:$0 sm:$0xff] }
 0x1e8   :  { %v674_v59 = vmax.f32 %v670_v55, 0.0  ;;  %v678_v62 = vpack.c.bf16 %v676_v56, %v675_v60 }
 0x1ea   :  { %v677_v61 = vpack.c.bf16 %v674_v59, %v673_v58 }
 0x1ec   :  { %2821 = vmatprep.mubr.msk.bf16.mxu1 %vm194_vm0, %v677_v61  ;;  %2837 = vmatprep.mubr.msk.bf16.mxu0 %vm194_vm0, %v677_v61 }
 0x1ed   :  { %v2811_v49 = vpop.f32.mrf.mxu0  ;;  %2822 = vmatmul.mubr.msk.bf16.gmra.mxu1 %vm194_vm0, %v678_v62  ;;  %2838 = vmatmul.mubr.msk.bf16.gmra.mxu0 %vm194_vm0, %v678_v62 }
 0x1ee   :  { %v751_v57 = vadd.f32 %v2811_v49, %v3454_v6  ;;  %v3264_v6 = vmov 0.0   ;;  %v3063_v49 = vld [vmem:[%s3826_s9 + $0x10] sm:$0xff]  }
 0x1ef   :  { %v734_v52 = vpop.f32.mrf.mxu0  ;;  %2845 = vmatprep.subr.bf16.mxu1 %v3264_v6  ;;  %2861 = vmatprep.subr.bf16.mxu0 %v3264_v6 }
 0x1f0   :  { %v749_v54 = vadd.f32 %v734_v52, %v3457_v8  ;;  %v755_v5 = vadd.f32 %v2501_v28, %v751_v57  ;;  %v3064_v52 = vld [vmem:[%s3826_s9 + $0x18] sm:$0xff]  }
 0x1f1   :  { %v2812_v63 = vpop.f32.mrf.mxu0 }
 0x1f2   :  { %v752_v0 = vadd.f32 %v2812_v63, %v3459_v9  ;;  %v753_v2 = vadd.f32 %v2501_v28, %v749_v54  ;;  %v759_v14 = vmax.f32 %v755_v5, 0.0 }
 0x1f3   :  { %v737_v1 = vpop.f32.mrf.mxu0 }
 0x1f4   :  { %v756_v3 = vadd.f32 %v2501_v28, %v752_v0  ;;  %v750_v4 = vadd.f32 %v737_v1, %v3461_v11  ;;  %v757_v12 = vmax.f32 %v753_v2, 0.0 }
 0x1f6   :  { %v754_v7 = vadd.f32 %v2501_v28, %v750_v4  ;;  %v760_v10 = vmax.f32 %v756_v3, 0.0 }
 0x1f8   :  { %v758_v13 = vmax.f32 %v754_v7, 0.0  ;;  %v762_v16 = vpack.c.bf16 %v760_v10, %v759_v14 }
 0x1fa   :  { %v761_v15 = vpack.c.bf16 %v758_v13, %v757_v12 }
 0x1fc   :  { %2825 = vmatprep.mubr.msk.bf16.mxu1 %vm194_vm0, %v761_v15  ;;  %2841 = vmatprep.mubr.msk.bf16.mxu0 %vm194_vm0, %v761_v15 }
 0x1fd   :  { %2826 = vmatmul.mubr.msk.bf16.gmra.mxu1 %vm194_vm0, %v762_v16  ;;  %2842 = vmatmul.mubr.msk.bf16.gmra.mxu0 %vm194_vm0, %v762_v16 }
 0x1fe   :  { %2849 = vmatprep.mubr.msk.bf16.mxu1 %vm3265_vm2, %v3264_v6  ;;  %2865 = vmatprep.mubr.msk.bf16.mxu0 %vm3265_vm2, %v3264_v6 }
 0x29d   :  { %v2819_v8 = vpop.f32.mrf.mxu1  ;;  %v2835_v9 = vpop.f32.mrf.mxu0 }
 0x29f   :  { %v831_v11 = vpop.f32.mrf.mxu1  ;;  %v922_v17 = vpop.f32.mrf.mxu0 }
 0x2a1   :  { %v2820_v18 = vpop.f32.mrf.mxu1  ;;  %v2836_v19 = vpop.f32.mrf.mxu0 }
 0x2a2   :  { %v970_v20 = vpack.c.bf16 %v2836_v19, %v2835_v9  ;;  %v3614_v18 = vld [vmem:[%s3827_s10 + $0x10] sm:$0xff]   ;;  %v3619_v19 = vld [vmem:[%s3827_s10 + $0x18] sm:$0xff]  }
 0x2a3   :  { %v925_v21 = vpop.f32.mrf.mxu0  ;;  %v834_v24 = vpop.f32.mrf.mxu1 }
 0x2a4   :  { %2846 = vmatpush3.bf16.msra.mxu1 %v970_v20  ;;  %v969_v22 = vpack.c.bf16 %v925_v21, %v922_v17  ;;  %v3587_v17 = vld [vmem:[%s3827_s10 + $0x8] sm:$0xff]   ;;  %v3266_v20 = vmov 0  }
 0x2a5   :  { %2847 = vmatprep.subr.bf16.mxu1 %v3264_v6 }
 0x2a8   :  { %2848 = vmatpush3.bf16.msra.mxu1 %v969_v22 }
 0x2a9   :  { %2853 = vmatprep.subr.bf16.mxu1 %v3264_v6 }
 0x2ab   :  { %2850 = vmatmul.mubr.msk.bf16.vlgmr.msra.gmra.mxu1 %vm194_vm0, %v3058_v23 }
 0x2ac   :  { %2857 = vmatprep.mubr.msk.bf16.mxu1 %vm3265_vm2, %v3264_v6 }
 0x2ad   :  { %v2823_v25 = vpop.f32.mrf.mxu1  ;;  %v2839_v26 = vpop.f32.mrf.mxu0 }
 0x2af   :  { %v845_v28 = vpop.f32.mrf.mxu1  ;;  %v938_v29 = vpop.f32.mrf.mxu0 }
 0x2b1   :  { %v2824_v31 = vpop.f32.mrf.mxu1  ;;  %v2840_v33 = vpop.f32.mrf.mxu0 }
 0x2b2   :  { %v972_v34 = vpack.c.bf16 %v2840_v33, %v2839_v26  ;;  %v3648_v31 = vld [vmem:[%s3828_s11] ss:$0 sm:$0xff]  ;;  %v3653_v33 = vld [vmem:[%s3828_s11 + $0x1] ss:$0 sm:$0xff] }
 0x2b3   :  { %v941_v36 = vpop.f32.mrf.mxu0  ;;  %v848_v39 = vpop.f32.mrf.mxu1 }
 0x2b4   :  { %2854 = vmatpush3.bf16.msra.mxu1 %v972_v34  ;;  %v971_v37 = vpack.c.bf16 %v941_v36, %v938_v29 }
 0x2b5   :  { %2855 = vmatprep.subr.bf16.mxu1 %v3264_v6 }
 0x2b8   :  { %2856 = vmatpush3.bf16.msra.mxu1 %v971_v37 }
 0x2b9   :  { %2869 = vmatprep.subr.bf16.mxu1 %v3264_v6 }
 0x2bb   :  { %2858 = vmatmul.mubr.msk.bf16.vlgmr.msra.gmra.mxu1 %vm194_vm0, %v3059_v38 }
 0x2bc   :  { %2871 = vmatprep.mubr.msk.bf16.mxu1 %vm3265_vm2, %v3264_v6  ;;  %2870 = vmatpush3.bf16.msra.mxu1 %v3061_v46 }
 0x2bd   :  { %v2827_v40 = vpop.f32.mrf.mxu1  ;;  %v2843_v41 = vpop.f32.mrf.mxu0  ;;  %2897 = vmatprep.subr.bf16.mxu1 %v3264_v6 }
 0x2bf   :  { %v859_v30 = vpop.f32.mrf.mxu1  ;;  %v954_v42 = vpop.f32.mrf.mxu0 }
 0x2c1   :  { %v2828_v27 = vpop.f32.mrf.mxu1  ;;  %v2844_v43 = vpop.f32.mrf.mxu0 }
 0x2c2   :  { %v974_v32 = vpack.c.bf16 %v2844_v43, %v2843_v41 }
 0x2c3   :  { %v957_v35 = vpop.f32.mrf.mxu0  ;;  %v862_v48 = vpop.f32.mrf.mxu1 }
 0x2c4   :  { %2862 = vmatpush3.bf16.msra.mxu0 %v974_v32  ;;  %v973_v44 = vpack.c.bf16 %v957_v35, %v954_v42 }
 0x2c5   :  { %2863 = vmatprep.subr.bf16.mxu0 %v3264_v6 }
 0x2c8   :  { %2864 = vmatpush3.bf16.msra.mxu0 %v973_v44 }
 0x2c9   :  { %2883 = vmatprep.subr.bf16.mxu0 %v3264_v6 }
 0x2cb   :  { %2866 = vmatmul.mubr.msk.bf16.vlgmr.msra.gmra.mxu0 %vm194_vm0, %v3060_v45 }
 0x2cc   :  { %2885 = vmatprep.mubr.msk.bf16.mxu0 %vm3265_vm2, %v3264_v6  ;;  %2884 = vmatpush3.bf16.msra.mxu0 %v3062_v47 }
 0x2cd   :  { %2911 = vmatprep.subr.bf16.mxu0 %v3264_v6 }
 0x36b   :  { %v1019_v51 = vpop.f32.mrf.mxu1 }
 0x36c   :  { %v1026_v53 = vadd.f32 %v1019_v51, %v831_v11  ;;  %v3582_v11 = vld [vmem:[%s3827_s10] sm:$0xff]  }
 0x36d   :  { %v2851_v55 = vpop.f32.mrf.mxu1 }
 0x36e   :  { %v1034_v56 = vadd.f32 %v2536_v50, %v1026_v53 }
 0x36f   :  { %v1022_v58 = vpop.f32.mrf.mxu1 }
 0x370   :  { %1037 = vst.msk [vmem:[#allocation8] sm:$0xff] %vm1036_vm3, %v1034_v56  ;;  %v1027_v59 = vadd.f32 %v1022_v58, %v834_v24 }
 0x371   :  { %v2852_v60 = vpop.f32.mrf.mxu1 }
 0x372   :  { %v1035_v61 = vadd.f32 %v2536_v50, %v1027_v59 }
 0x374   :  { %1038 = vst.msk [vmem:[#allocation8 + $0x8] sm:$0xff] %vm1036_vm3, %v1035_v61  ;;  %v1039_v62 = vpack.c.bf16 %v1035_v61, %v1034_v56 }
 0x376   :  { %2872 = vmatmul.mubr.msk.bf16.vlgmr.msra.gmra.mxu1 %vm1036_vm3, %v1039_v62  ;;  %2886 = vmatmul.mubr.msk.bf16.vlgmr.msra.gmra.mxu0 %vm1036_vm3, %v1039_v62 }
 0x377   :  { %2875 = vmatprep.mubr.msk.bf16.mxu1 %vm3265_vm2, %v3264_v6  ;;  %2889 = vmatprep.mubr.msk.bf16.mxu0 %vm3265_vm2, %v3264_v6 }
 0x378   :  { %2898 = vmatpush3.bf16.msra.mxu1 %v3063_v49  ;;  %2912 = vmatpush3.bf16.msra.mxu0 %v3064_v52 }
 0x379   :  { %2925 = vmatprep.subr.bf16.mxu1 %v3264_v6  ;;  %2931 = vmatprep.subr.bf16.mxu0 %v3264_v6 }
 0x37b   :  { %v1085_v54 = vpop.f32.mrf.mxu1 }
 0x37c   :  { %v1092_v57 = vadd.f32 %v1085_v54, %v845_v28 }
 0x37d   :  { %v2859_v63 = vpop.f32.mrf.mxu1 }
 0x37e   :  { %v1094_v0 = vadd.f32 %v2536_v50, %v1092_v57  ;;  %v3686_v63 = vld [vmem:[%s3828_s11 + $0x2] ss:$0 sm:$0xff] }
 0x37f   :  { %v1088_v1 = vpop.f32.mrf.mxu1 }
 0x380   :  { %1097 = vst.msk [vmem:[#allocation8 + $0x10] sm:$0xff] %vm1036_vm3, %v1094_v0  ;;  %v1093_v2 = vadd.f32 %v1088_v1, %v848_v39 }
 0x381   :  { %v2860_v3 = vpop.f32.mrf.mxu1 }
 0x382   :  { %v1095_v4 = vadd.f32 %v2536_v50, %v1093_v2 }
 0x384   :  { %1098 = vst.msk [vmem:[#allocation8 + $0x18] sm:$0xff] %vm1036_vm3, %v1095_v4  ;;  %v1099_v5 = vpack.c.bf16 %v1095_v4, %v1094_v0  ;;  %v2569_v0 = vld [vmem:[%s3828_s11 + $0x3] ss:$0 sm:$0xff] }
 0x386   :  { %2876 = vmatmul.mubr.msk.bf16.gmra.mxu1 %vm1036_vm3, %v1099_v5  ;;  %2890 = vmatmul.mubr.msk.bf16.gmra.mxu0 %vm1036_vm3, %v1099_v5 }
 0x387   :  { %2879 = vmatprep.mubr.msk.bf16.mxu1 %vm3265_vm2, %v3264_v6  ;;  %2893 = vmatprep.mubr.msk.bf16.mxu0 %vm3265_vm2, %v3264_v6 }
 0x38b   :  { %v1145_v7 = vpop.f32.mrf.mxu0 }
 0x38c   :  { %v1152_v10 = vadd.f32 %v1145_v7, %v859_v30 }
 0x38d   :  { %v2867_v12 = vpop.f32.mrf.mxu0 }
 0x38e   :  { %v1154_v13 = vadd.f32 %v2536_v50, %v1152_v10 }
 0x38f   :  { %v1148_v14 = vpop.f32.mrf.mxu0 }
 0x390   :  { %1157 = vst.msk [vmem:[#allocation8 + $0x20] sm:$0xff] %vm1036_vm3, %v1154_v13  ;;  %v1153_v15 = vadd.f32 %v1148_v14, %v862_v48 }
 0x391   :  { %v2868_v16 = vpop.f32.mrf.mxu0 }
 0x392   :  { %v1155_v8 = vadd.f32 %v2536_v50, %v1153_v15 }
 0x394   :  { %1158 = vst.msk [vmem:[#allocation8 + $0x28] sm:$0xff] %vm1036_vm3, %v1155_v8  ;;  %v1159_v9 = vpack.c.bf16 %v1155_v8, %v1154_v13 }
 0x396   :  { %2880 = vmatmul.mubr.msk.bf16.gmra.mxu1 %vm1036_vm3, %v1159_v9  ;;  %2894 = vmatmul.mubr.msk.bf16.gmra.mxu0 %vm1036_vm3, %v1159_v9 }
 0x397   :  { %2899 = vmatprep.mubr.msk.bf16.mxu1 %vm3265_vm2, %v3264_v6  ;;  %2913 = vmatprep.mubr.msk.bf16.mxu0 %vm3265_vm2, %v3264_v6 }
 0x39e   :  { %2900 = vmatmul.mubr.msk.bf16.vlgmr.msra.gmra.mxu1 %vm1036_vm3, %v1039_v62  ;;  %2914 = vmatmul.mubr.msk.bf16.vlgmr.msra.gmra.mxu0 %vm1036_vm3, %v1039_v62 }
 0x39f   :  { %2903 = vmatprep.mubr.msk.bf16.mxu1 %vm3265_vm2, %v3264_v6  ;;  %2917 = vmatprep.mubr.msk.bf16.mxu0 %vm3265_vm2, %v3264_v6 }
 0x3a0   :  { %2926 = vmatpush3.bf16.msra.mxu1 %v3582_v11  ;;  %2932 = vmatpush3.bf16.msra.mxu0 %v3587_v17 }
 0x3a1   :  { %2937 = vmatprep.subr.bf16.mxu1 %v3264_v6  ;;  %2943 = vmatprep.subr.bf16.mxu0 %v3264_v6 }
 0x3a6   :  { %2904 = vmatmul.mubr.msk.bf16.gmra.mxu1 %vm1036_vm3, %v1099_v5  ;;  %2918 = vmatmul.mubr.msk.bf16.gmra.mxu0 %vm1036_vm3, %v1099_v5 }
 0x3a7   :  { %2907 = vmatprep.mubr.msk.bf16.mxu1 %vm3265_vm2, %v3264_v6  ;;  %2921 = vmatprep.mubr.msk.bf16.mxu0 %vm3265_vm2, %v3264_v6 }
 0x3ae   :  { %2908 = vmatmul.mubr.msk.bf16.gmra.mxu1 %vm1036_vm3, %v1159_v9  ;;  %2922 = vmatmul.mubr.msk.bf16.gmra.mxu0 %vm1036_vm3, %v1159_v9 }
 0x3af   :  { %2927 = vmatprep.mubr.msk.bf16.mxu1 %vm3265_vm2, %v3264_v6  ;;  %2933 = vmatprep.mubr.msk.bf16.mxu0 %vm3265_vm2, %v3264_v6 }
 0x3b6   :  { %2928 = vmatmul.mubr.bf16.vlgmr.msra.gmra.mxu1 %v3266_v20  ;;  %2934 = vmatmul.mubr.bf16.vlgmr.msra.gmra.mxu0 %v3266_v20 }
 0x3b7   :  { %2938 = vmatpush3.bf16.msra.mxu1 %v3614_v18  ;;  %2944 = vmatpush3.bf16.msra.mxu0 %v3619_v19 }
 0x3b8   :  { %2939 = vmatprep.mubr.msk.bf16.mxu1 %vm3265_vm2, %v3264_v6  ;;  %2945 = vmatprep.mubr.msk.bf16.mxu0 %vm3265_vm2, %v3264_v6 }
 0x3b9   :  { %2949 = vmatprep.subr.bf16.mxu1 %v3264_v6  ;;  %2955 = vmatprep.subr.bf16.mxu0 %v3264_v6 }
 0x3be   :  { %2940 = vmatmul.mubr.bf16.vlgmr.msra.gmra.mxu1 %v3266_v20  ;;  %2946 = vmatmul.mubr.bf16.vlgmr.msra.gmra.mxu0 %v3266_v20 }
 0x3bf   :  { %2950 = vmatpush3.bf16.msra.mxu1 %v3582_v11  ;;  %2956 = vmatpush3.bf16.msra.mxu0 %v3587_v17 }
 0x3c0   :  { %2951 = vmatprep.mubr.msk.bf16.mxu1 %vm3265_vm2, %v3264_v6  ;;  %2957 = vmatprep.mubr.msk.bf16.mxu0 %vm3265_vm2, %v3264_v6 }
 0x3c1   :  { %2961 = vmatprep.subr.bf16.mxu1 %v3264_v6  ;;  %2967 = vmatprep.subr.bf16.mxu0 %v3264_v6 }
 0x436   :  { %v3637_v21 = vpop.f32.mrf.mxu1  ;;  %v3639_v22 = vpop.f32.mrf.mxu0 }
 0x438   :  { %v2873_v23 = vpop.f32.mrf.mxu1  ;;  %v2887_v24 = vpop.f32.mrf.mxu0 }
 0x43a   :  { %v3641_v25 = vpop.f32.mrf.mxu1  ;;  %v3643_v26 = vpop.f32.mrf.mxu0 }
 0x43c   :  { %v2874_v28 = vpop.f32.mrf.mxu1  ;;  %v2888_v29 = vpop.f32.mrf.mxu0 }
 0x446   :  { %v1226_v34 = vpop.f32.mrf.mxu1  ;;  %v1300_v36 = vpop.f32.mrf.mxu0 }
 0x447   :  { %v3656_v37 = vadd.f32 %v3648_v31, %v1226_v34  ;;  %v3659_v38 = vadd.f32 %v3653_v33, %v1300_v36 }
 0x448   :  { %v2877_v39 = vpop.f32.mrf.mxu1  ;;  %v2891_v40 = vpop.f32.mrf.mxu0 }
 0x44a   :  { %v1229_v41 = vpop.f32.mrf.mxu1  ;;  %v1303_v30 = vpop.f32.mrf.mxu0 }
 0x44b   :  { %v3662_v42 = vadd.f32 %v3648_v31, %v1229_v41  ;;  %v3665_v27 = vadd.f32 %v3653_v33, %v1303_v30  ;;  %v1219_v30 = vadd.f32 %v3648_v31, %v3637_v21 }
 0x44c   :  { %v2878_v43 = vpop.f32.mrf.mxu1  ;;  %v2892_v32 = vpop.f32.mrf.mxu0 }
 0x44d   :  { %v1293_v43 = vadd.f32 %v3653_v33, %v3639_v22 }
 0x456   :  { %v1234_v35 = vpop.f32.mrf.mxu1  ;;  %v1308_v44 = vpop.f32.mrf.mxu0 }
 0x457   :  { %v3668_v45 = vadd.f32 %v3648_v31, %v1234_v35  ;;  %v3671_v46 = vadd.f32 %v3653_v33, %v1308_v44 }
 0x458   :  { %v2881_v47 = vpop.f32.mrf.mxu1  ;;  %v2895_v48 = vpop.f32.mrf.mxu0 }
 0x45a   :  { %v1237_v50 = vpop.f32.mrf.mxu1  ;;  %v1311_v51 = vpop.f32.mrf.mxu0 }
 0x45b   :  { %v3674_v53 = vadd.f32 %v3648_v31, %v1237_v50  ;;  %v3677_v55 = vadd.f32 %v3653_v33, %v1311_v51  ;;  %v1222_v51 = vadd.f32 %v3648_v31, %v3641_v25 }
 0x45c   :  { %v2882_v56 = vpop.f32.mrf.mxu1  ;;  %v2896_v58 = vpop.f32.mrf.mxu0 }
 0x45d   :  { %v1296_v56 = vadd.f32 %v3653_v33, %v3643_v26 }
 0x45e   :  { %v3679_v59 = vpop.f32.mrf.mxu1  ;;  %v1440_v60 = vpop.f32.mrf.mxu0 }
 0x460   :  { %v2901_v61 = vpop.f32.mrf.mxu1  ;;  %v2915_v62 = vpop.f32.mrf.mxu0 }
 0x462   :  { %v3681_v49 = vpop.f32.mrf.mxu1  ;;  %v1443_v52 = vpop.f32.mrf.mxu0 }
 0x464   :  { %v2902_v54 = vpop.f32.mrf.mxu1  ;;  %v2916_v57 = vpop.f32.mrf.mxu0 }
 0x466   :  { %v1374_v1 = vpop.f32.mrf.mxu1  ;;  %v1448_v2 = vpop.f32.mrf.mxu0 }
 0x467   :  { %v3692_v3 = vadd.f32 %v3686_v63, %v1374_v1  ;;  %v3694_v4 = vadd.f32 %v2569_v0, %v1448_v2 }
 0x468   :  { %v2905_v5 = vpop.f32.mrf.mxu1  ;;  %v2919_v7 = vpop.f32.mrf.mxu0 }
 0x46a   :  { %v1377_v10 = vpop.f32.mrf.mxu1  ;;  %v1451_v12 = vpop.f32.mrf.mxu0 }
 0x46b   :  { %v3697_v13 = vadd.f32 %v3686_v63, %v1377_v10  ;;  %v3699_v14 = vadd.f32 %v2569_v0, %v1451_v12  ;;  %v1441_v12 = vadd.f32 %v2569_v0, %v1440_v60  ;;  %v1367_v60 = vadd.f32 %v3686_v63, %v3679_v59 }
 0x46c   :  { %v2906_v15 = vpop.f32.mrf.mxu1  ;;  %v2920_v16 = vpop.f32.mrf.mxu0 }
 0x46e   :  { %v1382_v8 = vpop.f32.mrf.mxu1  ;;  %v1456_v9 = vpop.f32.mrf.mxu0 }
 0x46f   :  { %v3702_v20 = vadd.f32 %v3686_v63, %v1382_v8  ;;  %v3704_v23 = vadd.f32 %v2569_v0, %v1456_v9  ;;  %v1444_v9 = vadd.f32 %v2569_v0, %v1443_v52 }
 0x470   :  { %v2909_v24 = vpop.f32.mrf.mxu1  ;;  %v2923_v28 = vpop.f32.mrf.mxu0 }
 0x472   :  { %v1385_v29 = vpop.f32.mrf.mxu1  ;;  %v1459_v34 = vpop.f32.mrf.mxu0 }
 0x473   :  { %v3707_v36 = vadd.f32 %v3686_v63, %v1385_v29  ;;  %v3709_v39 = vadd.f32 %v2569_v0, %v1459_v34 }
 0x474   :  { %v2910_v40 = vpop.f32.mrf.mxu1  ;;  %v2924_v41 = vpop.f32.mrf.mxu0 }
 0x476   :  { %v1508_v32 = vpop.f32.mrf.mxu1  ;;  %v1560_v35 = vpop.f32.mrf.mxu0 }
 0x477   :  { %v1515_v44 = vadd.f32 %v1508_v32, %v1219_v30  ;;  %v1567_v47 = vadd.f32 %v1560_v35, %v1293_v43 }
 0x478   :  { %v2929_v48 = vpop.f32.mrf.mxu1  ;;  %v2935_v50 = vpop.f32.mrf.mxu0 }
 0x479   :  { %v1673_v58 = vsub.f32 0.0, %v1515_v44  ;;  %v1685_v61 = vsub.f32 0.0, %v1567_v47  ;;  %v1370_v44 = vadd.f32 %v3686_v63, %v3681_v49 }
 0x47a   :  { %v1511_v62 = vpop.f32.mrf.mxu1  ;;  %v1563_v54 = vpop.f32.mrf.mxu0 }
 0x47b   :  { %v1675_v21 = vmul.f32 1.442695, %v1673_v58  ;;  %v1687_v57 = vmul.f32 1.442695, %v1685_v61  ;;  %v1516_v1 = vadd.f32 %v1511_v62, %v1222_v51  ;;  %v1568_v22 = vadd.f32 %v1563_v54, %v1296_v56 }
 0x47c   :  { %v2930_v2 = vpop.f32.mrf.mxu1  ;;  %v2936_v5 = vpop.f32.mrf.mxu0 }
 0x47d   :  { %3073 = vpow2.f32 %v1675_v21  ;;  %v1674_v7 = vsub.f32 0.0, %v1516_v1  ;;  %v1686_v10 = vsub.f32 0.0, %v1568_v22 }
 0x47e   :  { %3075 = vpow2.f32 %v1687_v57  ;;  %v1612_v15 = vpop.f32.mrf.mxu1  ;;  %v1664_v25 = vpop.f32.mrf.mxu0 }
 0x47f   :  { %v1677_v31 = vmul.f32 1.442695, %v1674_v7  ;;  %v1689_v16 = vmul.f32 1.442695, %v1686_v10  ;;  %v1671_v26 = vadd.f32 %v1664_v25, %v1441_v12  ;;  %v1619_v30 = vadd.f32 %v1612_v15, %v1367_v60 }
 0x480   :  { %v2941_v33 = vpop.f32.mrf.mxu1  ;;  %v2947_v8 = vpop.f32.mrf.mxu0 }
 0x481   :  { %3077 = vpow2.f32 %v1677_v31  ;;  %v1699_v34 = vsub.f32 0.0, %v1671_v26 }
 0x482   :  { %3079 = vpow2.f32 %v1689_v16  ;;  %v1615_v24 = vpop.f32.mrf.mxu1  ;;  %v1667_v28 = vpop.f32.mrf.mxu0 }
 0x483   :  { %v1672_v29 = vadd.f32 %v1667_v28, %v1444_v9  ;;  %v1701_v32 = vmul.f32 1.442695, %v1699_v34  ;;  %3081 = vtanh.f32 %v1619_v30  ;;  %v1620_v50 = vadd.f32 %v1615_v24, %v1370_v44 }
 0x484   :  { %v2948_v40 = vpop.f32.mrf.mxu0  ;;  %v2942_v41 = vpop.f32.mrf.mxu1 }
 0x485   :  { %v1700_v43 = vsub.f32 0.0, %v1672_v29  ;;  %3083 = vpow2.f32 %v1701_v32 }
 0x487   :  { %v1703_v0 = vmul.f32 1.442695, %v1700_v43 }
 0x48a   :  { %v3074_v35 = vpop.eup %3073 }
 0x48b   :  { %v3076_v47 = vpop.eup %3075  ;;  %v1679_v52 = vadd.f32 1.0, %v3074_v35 }
 0x48c   :  { %v1691_v48 = vadd.f32 1.0, %v3076_v47 }
 0x48d   :  { %3085 = vrcp.f32 %v1679_v52 }
 0x48e   :  { %v3078_v51 = vpop.eup %3077  ;;  %3087 = vrcp.f32 %v1691_v48 }
 0x48f   :  { %v3080_v56 = vpop.eup %3079  ;;  %v1680_v58 = vadd.f32 1.0, %v3078_v51  ;;  %3089 = vpow2.f32 %v1703_v0 }
 0x490   :  { %v1692_v59 = vadd.f32 1.0, %v3080_v56  ;;  %3091 = vtanh.f32 %v1620_v50  ;;  %v3082_v61 = vpop.eup %3081 }
 0x491   :  { %3093 = vrcp.f32 %v1680_v58 }
 0x492   :  { %3095 = vrcp.f32 %v1692_v59  ;;  %v3084_v62 = vpop.eup %3083 }
 0x493   :  { %v1705_v22 = vadd.f32 1.0, %v3084_v62 }
 0x495   :  { %3097 = vrcp.f32 %v1705_v22 }
 0x49a   :  { %v3086_v49 = vpop.eup %3085 }
 0x49b   :  { %v3088_v63 = vpop.eup %3087  ;;  %v1713_v54 = vmul.f32 %v3086_v49, %v3082_v61 }
 0x49c   :  { %v3090_v21 = vpop.eup %3089  ;;  %v1711_v57 = vmul.f32 0.0, %v3088_v63 }
 0x49d   :  { %v3092_v1 = vpop.eup %3091  ;;  %v1706_v12 = vadd.f32 1.0, %v3090_v21 }
 0x49e   :  { %v3094_v2 = vpop.eup %3093  ;;  %v3723_v5 = vadd.f32 %v1713_v54, %v1711_v57 }
 0x49f   :  { %v3096_v7 = vpop.eup %3095  ;;  %v1714_v10 = vmul.f32 %v3094_v2, %v3092_v1 }
 0x4a0   :  { %v1712_v15 = vmul.f32 0.0, %v3096_v7  ;;  %3099 = vtanh.f32 %v3723_v5 }
 0x4a1   :  { %3101 = vrcp.f32 %v1706_v12 }
 0x4a2   :  { %v3726_v25 = vadd.f32 %v1714_v10, %v1712_v15  ;;  %v3098_v31 = vpop.eup %3097 }
 0x4a4   :  { %3103 = vtanh.f32 %v3726_v25 }
 0x4ad   :  { %v3100_v16 = vpop.eup %3099 }
 0x4ae   :  { %v3102_v26 = vpop.eup %3101  ;;  %v1719_v8 = vmul.f32 %v3100_v16, %v3098_v31 }
 0x4b1   :  { %v3104_v33 = vpop.eup %3103 }
 0x4b2   :  { %v1720_v9 = vmul.f32 %v3104_v33, %v3102_v26 }
 0x4b4   :  { %v1721_v24 = vpack.c.bf16 %v1720_v9, %v1719_v8 }
 0x4b6   :  { %2952 = vmatmul.mubr.msk.bf16.vlgmr.msra.gmra.mxu1 %vm1036_vm3, %v1721_v24  ;;  %2958 = vmatmul.mubr.msk.bf16.vlgmr.msra.gmra.mxu0 %vm1036_vm3, %v1721_v24 }
 0x4b7   :  { %2962 = vmatpush3.bf16.msra.mxu1 %v3614_v18  ;;  %2968 = vmatpush3.bf16.msra.mxu0 %v3619_v19 }
 0x4b8   :  { %2963 = vmatprep.mubr.msk.bf16.mxu1 %vm3265_vm2, %v3264_v6  ;;  %2969 = vmatprep.mubr.msk.bf16.mxu0 %vm3265_vm2, %v3264_v6 }
 0x4b9   :  { %2973 = vmatprep.subr.bf16.mxu1 %v3264_v6  ;;  %2979 = vmatprep.subr.bf16.mxu0 %v3264_v6 }
 0x4be   :  { %2964 = vmatmul.mubr.msk.bf16.vlgmr.msra.gmra.mxu1 %vm1036_vm3, %v1721_v24  ;;  %2970 = vmatmul.mubr.msk.bf16.vlgmr.msra.gmra.mxu0 %vm1036_vm3, %v1721_v24 }
 0x4bf   :  { %2974 = vmatpush3.bf16.msra.mxu1 %v3582_v11  ;;  %2980 = vmatpush3.bf16.msra.mxu0 %v3587_v17 }
 0x4c0   :  { %2975 = vmatprep.mubr.msk.bf16.mxu1 %vm3265_vm2, %v3264_v6  ;;  %2981 = vmatprep.mubr.msk.bf16.mxu0 %vm3265_vm2, %v3264_v6 }
 0x4c1   :  { %2985 = vmatprep.subr.bf16.mxu1 %v3264_v6  ;;  %2991 = vmatprep.subr.bf16.mxu0 %v3264_v6 }
 0x576   :  { %v1759_v28 = vpop.f32.mrf.mxu1  ;;  %v1802_v29 = vpop.f32.mrf.mxu0 }
 0x577   :  { %v1766_v34 = vadd.f32 %v1759_v28, %v3656_v37  ;;  %v1809_v40 = vadd.f32 %v1802_v29, %v3659_v38 }
 0x578   :  { %v2953_v41 = vpop.f32.mrf.mxu1  ;;  %v2959_v11 = vpop.f32.mrf.mxu0 }
 0x579   :  { %v1897_v60 = vsub.f32 0.0, %v1766_v34  ;;  %v1909_v17 = vsub.f32 0.0, %v1809_v40 }
 0x57a   :  { %v1762_v30 = vpop.f32.mrf.mxu1  ;;  %v1805_v43 = vpop.f32.mrf.mxu0 }
 0x57b   :  { %v1899_v32 = vmul.f32 1.442695, %v1897_v60  ;;  %v1911_v35 = vmul.f32 1.442695, %v1909_v17  ;;  %v1767_v44 = vadd.f32 %v1762_v30, %v3662_v42  ;;  %v1810_v47 = vadd.f32 %v1805_v43, %v3665_v27 }
 0x57c   :  { %v2954_v52 = vpop.f32.mrf.mxu1  ;;  %v2960_v0 = vpop.f32.mrf.mxu0 }
 0x57d   :  { %3105 = vpow2.f32 %v1899_v32  ;;  %v1898_v48 = vsub.f32 0.0, %v1767_v44  ;;  %v1910_v50 = vsub.f32 0.0, %v1810_v47 }
 0x57e   :  { %3107 = vpow2.f32 %v1911_v35  ;;  %v1845_v37 = vpop.f32.mrf.mxu1  ;;  %v1888_v38 = vpop.f32.mrf.mxu0 }
 0x57f   :  { %v1901_v51 = vmul.f32 1.442695, %v1898_v48  ;;  %v1913_v56 = vmul.f32 1.442695, %v1910_v50  ;;  %v1895_v58 = vadd.f32 %v1888_v38, %v3694_v4  ;;  %v1852_v21 = vadd.f32 %v1845_v37, %v3692_v3 }
 0x580   :  { %v2965_v59 = vpop.f32.mrf.mxu1  ;;  %v2971_v61 = vpop.f32.mrf.mxu0 }
 0x581   :  { %3109 = vpow2.f32 %v1901_v51  ;;  %v1923_v49 = vsub.f32 0.0, %v1895_v58 }
 0x582   :  { %3111 = vpow2.f32 %v1913_v56  ;;  %v1848_v62 = vpop.f32.mrf.mxu1  ;;  %v1891_v42 = vpop.f32.mrf.mxu0 }
 0x583   :  { %v1896_v27 = vadd.f32 %v1891_v42, %v3699_v14  ;;  %v1925_v1 = vmul.f32 1.442695, %v1923_v49  ;;  %3113 = vtanh.f32 %v1852_v21  ;;  %v1853_v12 = vadd.f32 %v1848_v62, %v3697_v13 }
 0x584   :  { %v2966_v63 = vpop.f32.mrf.mxu1  ;;  %v2972_v54 = vpop.f32.mrf.mxu0 }
 0x585   :  { %v1924_v57 = vsub.f32 0.0, %v1896_v27  ;;  %3115 = vpow2.f32 %v1925_v1 }
 0x587   :  { %v1927_v4 = vmul.f32 1.442695, %v1924_v57 }
 0x58a   :  { %v3106_v22 = vpop.eup %3105 }
 0x58b   :  { %v3108_v2 = vpop.eup %3107  ;;  %v1903_v7 = vadd.f32 1.0, %v3106_v22 }
 0x58c   :  { %v1915_v10 = vadd.f32 1.0, %v3108_v2 }
 0x58d   :  { %3117 = vrcp.f32 %v1903_v7 }
 0x58e   :  { %v3110_v15 = vpop.eup %3109  ;;  %3119 = vrcp.f32 %v1915_v10 }
 0x58f   :  { %v3112_v14 = vpop.eup %3111  ;;  %v1904_v31 = vadd.f32 1.0, %v3110_v15  ;;  %3121 = vpow2.f32 %v1927_v4 }
 0x590   :  { %v1916_v16 = vadd.f32 1.0, %v3112_v14  ;;  %3123 = vtanh.f32 %v1853_v12  ;;  %v3114_v3 = vpop.eup %3113 }
 0x591   :  { %3125 = vrcp.f32 %v1904_v31 }
 0x592   :  { %3127 = vrcp.f32 %v1916_v16  ;;  %v3116_v26 = vpop.eup %3115 }
 0x593   :  { %v1929_v13 = vadd.f32 1.0, %v3116_v26 }
 0x595   :  { %3129 = vrcp.f32 %v1929_v13 }
 0x59a   :  { %v3118_v33 = vpop.eup %3117 }
 0x59b   :  { %v3120_v8 = vpop.eup %3119  ;;  %v1937_v9 = vmul.f32 %v3118_v33, %v3114_v3 }
 0x59c   :  { %v3122_v24 = vpop.eup %3121  ;;  %v1935_v28 = vmul.f32 %v3120_v8, %v3723_v5 }
 0x59d   :  { %v3124_v29 = vpop.eup %3123  ;;  %v1930_v60 = vadd.f32 1.0, %v3122_v24 }
 0x59e   :  { %v3126_v34 = vpop.eup %3125  ;;  %v3758_v40 = vadd.f32 %v1937_v9, %v1935_v28 }
 0x59f   :  { %v3128_v41 = vpop.eup %3127  ;;  %v1938_v11 = vmul.f32 %v3126_v34, %v3124_v29 }
 0x5a0   :  { %v1936_v17 = vmul.f32 %v3128_v41, %v3726_v25  ;;  %3131 = vtanh.f32 %v3758_v40 }
 0x5a1   :  { %3133 = vrcp.f32 %v1930_v60 }
 0x5a2   :  { %v3762_v30 = vadd.f32 %v1938_v11, %v1936_v17  ;;  %v3130_v43 = vpop.eup %3129 }
 0x5a4   :  { %3135 = vtanh.f32 %v3762_v30 }
 0x5ad   :  { %v3132_v5 = vpop.eup %3131 }
 0x5ae   :  { %v3134_v32 = vpop.eup %3133  ;;  %v1943_v44 = vmul.f32 %v3132_v5, %v3130_v43 }
 0x5b1   :  { %v3136_v35 = vpop.eup %3135 }
 0x5b2   :  { %v1944_v47 = vmul.f32 %v3136_v35, %v3134_v32 }
 0x5b4   :  { %v1945_v52 = vpack.c.bf16 %v1944_v47, %v1943_v44 }
 0x5b6   :  { %2976 = vmatmul.mubr.msk.bf16.vlgmr.msra.gmra.mxu1 %vm1036_vm3, %v1945_v52  ;;  %2982 = vmatmul.mubr.msk.bf16.vlgmr.msra.gmra.mxu0 %vm1036_vm3, %v1945_v52 }
 0x5b7   :  { %2986 = vmatpush3.bf16.msra.mxu1 %v3614_v18  ;;  %2992 = vmatpush3.bf16.msra.mxu0 %v3619_v19 }
 0x5b8   :  { %2987 = vmatprep.mubr.msk.bf16.mxu1 %vm3265_vm2, %v3264_v6  ;;  %2993 = vmatprep.mubr.msk.bf16.mxu0 %vm3265_vm2, %v3264_v6 }
 0x5b9   :  { %2997 = vmatprep.subr.bf16.mxu1 %v3264_v6  ;;  %3003 = vmatprep.subr.bf16.mxu0 %v3264_v6 }
 0x5be   :  { %2988 = vmatmul.mubr.msk.bf16.vlgmr.msra.gmra.mxu1 %vm1036_vm3, %v1945_v52  ;;  %2994 = vmatmul.mubr.msk.bf16.vlgmr.msra.gmra.mxu0 %vm1036_vm3, %v1945_v52 }
 0x5bf   :  { %2999 = vmatprep.mubr.msk.bf16.mxu1 %vm3265_vm2, %v3264_v6  ;;  %3005 = vmatprep.mubr.msk.bf16.mxu0 %vm3265_vm2, %v3264_v6 }
 0x676   :  { %v1983_v18 = vpop.f32.mrf.mxu1  ;;  %v2026_v19 = vpop.f32.mrf.mxu0 }
 0x677   :  { %v1990_v25 = vadd.f32 %v1983_v18, %v3668_v45  ;;  %v2033_v0 = vadd.f32 %v2026_v19, %v3671_v46  ;;  %v3069_v18 = vld [vmem:[%s3829_s12] sm:$0xff]  }
 0x678   :  { %v2977_v48 = vpop.f32.mrf.mxu1  ;;  %v2983_v50 = vpop.f32.mrf.mxu0  ;;  %v3070_v19 = vld [vmem:[#allocation7] sm:$0xff]   ;;  %2998 = vmatpush3.bf16.msra.mxu1 %v3069_v18 }
 0x679   :  { %v2121_v37 = vsub.f32 0.0, %v1990_v25  ;;  %v2133_v38 = vsub.f32 0.0, %v2033_v0  ;;  %3004 = vmatpush3.bf16.msra.mxu0 %v3070_v19  ;;  %3009 = vmatprep.subr.bf16.mxu1 %v3264_v6 }
 0x67a   :  { %v1986_v51 = vpop.f32.mrf.mxu1  ;;  %v2029_v56 = vpop.f32.mrf.mxu0  ;;  %3015 = vmatprep.subr.bf16.mxu0 %v3264_v6 }
 0x67b   :  { %v2123_v58 = vmul.f32 1.442695, %v2121_v37  ;;  %v2135_v59 = vmul.f32 1.442695, %v2133_v38  ;;  %v1991_v61 = vadd.f32 %v1986_v51, %v3674_v53  ;;  %v2034_v62 = vadd.f32 %v2029_v56, %v3677_v55  ;;  %v3071_v38 = vld [vmem:[%s3829_s12 + $0x8] sm:$0xff]   ;;  %s2440_s12 = sshll.u32 %s3267_s29, 4  ;;  %s2441_s12 = int_to_ptr.vmem [resolvable:$true] %s2440_s12 }
 0x67c   :  { %v2978_v42 = vpop.f32.mrf.mxu1  ;;  %v2984_v27 = vpop.f32.mrf.mxu0  ;;  %v3072_v51 = vld [vmem:[#allocation7 + $0x8] sm:$0xff]   ;;  %s3233_s30 = scalar_lea.vmem %s2441_s12, 768  ;;  %p3238_p2 = scmp.lt.s32.totalorder %s2441_s12, %s2441_s12 }
 0x67d   :  { %3137 = vpow2.f32 %v2123_v58  ;;  %v2122_v49 = vsub.f32 0.0, %v1991_v61  ;;  %v2134_v63 = vsub.f32 0.0, %v2034_v62  ;;  %p3234_p1 = scmp.ne.s32.totalorder %s2441_s12, %s3233_s30  ;;  %p3239_p3 = scmp.lt.s32.totalorder %s3233_s30, %s3233_s30 }
 0x67e   :  { %3139 = vpow2.f32 %v2135_v59  ;;  %v2069_v45 = vpop.f32.mrf.mxu1  ;;  %v2112_v46 = vpop.f32.mrf.mxu0 }
 0x67f   :  { %v2125_v54 = vmul.f32 1.442695, %v2122_v49  ;;  %v2137_v21 = vmul.f32 1.442695, %v2134_v63  ;;  %v2119_v57 = vadd.f32 %v2112_v46, %v3704_v23  ;;  %v2076_v14 = vadd.f32 %v2069_v45, %v3702_v20  ;;  %p3240_p4 = por %p3239_p3, %p3238_p2 }
 0x680   :  { %v2989_v1 = vpop.f32.mrf.mxu1  ;;  %v2995_v22 = vpop.f32.mrf.mxu0 }
 0x681   :  { %3141 = vpow2.f32 %v2125_v54  ;;  %v2147_v7 = vsub.f32 0.0, %v2119_v57  ;;  %p3241_p5 = pnand %p3240_p4, %p3234_p1 }
 0x682   :  { %3143 = vpow2.f32 %v2137_v21  ;;  %v2072_v2 = vpop.f32.mrf.mxu1  ;;  %v2115_v53 = vpop.f32.mrf.mxu0 }
 0x683   :  { %v2120_v55 = vadd.f32 %v2115_v53, %v3709_v39  ;;  %v2149_v12 = vmul.f32 1.442695, %v2147_v7  ;;  %v2077_v33 = vadd.f32 %v2072_v2, %v3707_v36 }
 0x684   :  { %v2990_v4 = vpop.f32.mrf.mxu1  ;;  %v2996_v10 = vpop.f32.mrf.mxu0 }
 0x685   :  { %v2148_v15 = vsub.f32 0.0, %v2120_v55  ;;  %3145 = vpow2.f32 %v2149_v12 }
 0x686   :  { %3147 = vtanh.f32 %v2076_v14 }
 0x687   :  { %v2151_v23 = vmul.f32 1.442695, %v2148_v15 }
 0x68a   :  { %v3138_v31 = vpop.eup %3137 }
 0x68b   :  { %v3140_v16 = vpop.eup %3139  ;;  %v2127_v3 = vadd.f32 1.0, %v3138_v31 }
 0x68c   :  { %v2139_v26 = vadd.f32 1.0, %v3140_v16 }
 0x68d   :  { %3149 = vrcp.f32 %v2127_v3 }
 0x68e   :  { %v3142_v8 = vpop.eup %3141  ;;  %3151 = vrcp.f32 %v2139_v26 }
 0x68f   :  { %v3144_v9 = vpop.eup %3143  ;;  %v2128_v39 = vadd.f32 1.0, %v3142_v8  ;;  %3153 = vpow2.f32 %v2151_v23 }
 0x690   :  { %v2140_v24 = vadd.f32 1.0, %v3144_v9  ;;  %3155 = vtanh.f32 %v2077_v33 }
 0x691   :  { %3157 = vrcp.f32 %v2128_v39 }
 0x692   :  { %3159 = vrcp.f32 %v2140_v24  ;;  %v3146_v20 = vpop.eup %3145 }
 0x693   :  { %v3148_v28 = vpop.eup %3147  ;;  %v2153_v41 = vadd.f32 1.0, %v3146_v20 }
 0x695   :  { %3161 = vrcp.f32 %v2153_v41 }
 0x69a   :  { %v3150_v29 = vpop.eup %3149 }
 0x69b   :  { %v3152_v13 = vpop.eup %3151  ;;  %v2161_v34 = vmul.f32 %v3150_v29, %v3148_v28 }
 0x69c   :  { %v3154_v11 = vpop.eup %3153  ;;  %v2159_v60 = vmul.f32 %v3152_v13, %v3758_v40 }
 0x69d   :  { %v3156_v36 = vpop.eup %3155  ;;  %v2154_v35 = vadd.f32 1.0, %v3154_v11 }
 0x69e   :  { %v3158_v17 = vpop.eup %3157  ;;  %v2163_v43 = vadd.f32 %v2161_v34, %v2159_v60 }
 0x69f   :  { %v3160_v5 = vpop.eup %3159  ;;  %v2162_v32 = vmul.f32 %v3158_v17, %v3156_v36 }
 0x6a0   :  { %3163 = vtanh.f32 %v2163_v43  ;;  %v2160_v44 = vmul.f32 %v3160_v5, %v3762_v30 }
 0x6a1   :  { %3165 = vrcp.f32 %v2154_v35 }
 0x6a2   :  { %v2164_v47 = vadd.f32 %v2162_v32, %v2160_v44  ;;  %v3162_v52 = vpop.eup %3161 }
 0x6a4   :  { %3167 = vtanh.f32 %v2164_v47 }
 0x6ad   :  { %v3164_v40 = vpop.eup %3163 }
 0x6ae   :  { %v2167_v25 = vmul.f32 %v3164_v40, %v3162_v52  ;;  %v3166_v0 = vpop.eup %3165 }
 0x6b0   :  { %2169 = vxpose.xlu0.b32.start [1/2] (short) (narrow) %v2167_v25, 16 }
 0x6b1   :  { %v3168_v30 = vpop.eup %3167 }
 0x6b2   :  { %v2168_v48 = vmul.f32 %v3168_v30, %v3166_v0 }
 0x6b4   :  { %2170 = vxpose.xlu0.b32.end [2/2] (short) (narrow) %v2168_v48, 16 }
 0x72c   :  { %v2185_v50 = vpop.trf.xlu0 }
 0x730   :  { %v2186_v37 = vpop.trf.xlu0 }
 0x731   :  { %v2201_v56 = vpack.c.bf16 %v2186_v37, %v2185_v50 }
 0x733   :  { %3000 = vmatmul.mubr.msk.bf16.vlgmr.msra.gmra.mxu1 %vm1036_vm3, %v2201_v56  ;;  %3006 = vmatmul.mubr.msk.bf16.vlgmr.msra.gmra.mxu0 %vm1036_vm3, %v2201_v56 }
 0x734   :  { %3010 = vmatpush3.bf16.msra.mxu1 %v3071_v38  ;;  %3016 = vmatpush3.bf16.msra.mxu0 %v3072_v51 }
 0x735   :  { %3011 = vmatprep.mubr.msk.bf16.mxu1 %vm3265_vm2, %v3264_v6  ;;  %3017 = vmatprep.mubr.msk.bf16.mxu0 %vm3265_vm2, %v3264_v6 }
 0x73b   :  { %3012 = vmatmul.mubr.msk.bf16.vlgmr.msra.gmra.mxu1 %vm1036_vm3, %v2201_v56  ;;  %3018 = vmatmul.mubr.msk.bf16.vlgmr.msra.gmra.mxu0 %vm1036_vm3, %v2201_v56 }
 0x73c   :  { %3244 = shalt.err (!%p3241_p5)
}
 0x73d   :  { %s3268_s2 = smov 128   ;;  %s3269_s16 = smov 8   ;;  %vm2425_vm4 = vcmask 1040384   ;;  %vm2433_vm5 = vcmask 254976  }
 0x73e   :  { %2446 = dma.vmem_to_hbm [thread:$0]  %s2441_s12, 768, %s3831_s14, [#allocation4], %s3268_s2, %s3268_s2, %s3269_s16  }
 0x7f3   :  { %v2247_v6 = vpop.f32.mrf.mxu1  ;;  %v2296_v58 = vpop.f32.mrf.mxu0 }
 0x7f4   :  { %v2303_v62 = vmul.f32 %v2296_v58, %v2247_v6 }
 0x7f5   :  { %v3001_v59 = vpop.f32.mrf.mxu1  ;;  %v3007_v61 = vpop.f32.mrf.mxu0 }
 0x7f6   :  { %v2305_v46 = vsel %vm194_vm0, %v2303_v62, 0.0 }
 0x7f7   :  { %v2250_v42 = vpop.f32.mrf.mxu1  ;;  %v2299_v27 = vpop.f32.mrf.mxu0 }
 0x7f8   :  { %v2304_v49 = vmul.f32 %v2299_v27, %v2250_v42 }
 0x7f9   :  { %v3002_v63 = vpop.f32.mrf.mxu1  ;;  %v3008_v45 = vpop.f32.mrf.mxu0 }
 0x7fa   :  { %v2306_v54 = vsel %vm194_vm0, %v2304_v49, 0.0 }
 0x7fb   :  { %v2307_v21 = vadd.f32 %v2306_v54, %v2305_v46  ;;  %v2357_v57 = vpop.f32.mrf.mxu1  ;;  %v2407_v1 = vpop.f32.mrf.mxu0 }
 0x7fc   :  { %v2414_v7 = vmul.f32 %v2407_v1, %v2357_v57 }
 0x7fd   :  { %v2308_v22 = vrot.slane %v2307_v21, 4  ;;  %v3013_v2 = vpop.f32.mrf.mxu1  ;;  %v3019_v53 = vpop.f32.mrf.mxu0 }
 0x7fe   :  { %v2416_v31 = vsel %vm194_vm0, %v2414_v7, 0.0 }
 0x7ff   :  { %v2309_v55 = vadd.f32 %v2308_v22, %v2307_v21  ;;  %v2360_v4 = vpop.f32.mrf.mxu1  ;;  %v2410_v10 = vpop.f32.mrf.mxu0 }
 0x800   :  { %v2415_v12 = vmul.f32 %v2410_v10, %v2360_v4 }
 0x801   :  { %v3014_v15 = vpop.f32.mrf.mxu1  ;;  %v3020_v14 = vpop.f32.mrf.mxu0  ;;  %v2310_v3 = vrot.slane %v2309_v55, 2 }
 0x802   :  { %v2417_v16 = vsel %vm194_vm0, %v2415_v12, 0.0 }
 0x803   :  { %v2418_v23 = vadd.f32 %v2417_v16, %v2416_v31  ;;  %v2311_v33 = vadd.f32 %v2310_v3, %v2309_v55 }
 0x805   :  { %v2419_v26 = vrot.slane %v2418_v23, 4  ;;  %v2312_v39 = vrot.slane %v2311_v33, 1 }
 0x807   :  { %v2420_v8 = vadd.f32 %v2419_v26, %v2418_v23  ;;  %v2313_v28 = vadd.f32 %v2312_v39, %v2311_v33 }
 0x809   :  { %v2421_v9 = vrot.slane %v2420_v8, 2 }
 0x80b   :  { %v2422_v24 = vadd.f32 %v2421_v9, %v2420_v8 }
 0x80d   :  { %v2423_v20 = vrot.slane %v2422_v24, 1 }
 0x80f   :  { %v2424_v29 = vadd.f32 %v2423_v20, %v2422_v24 }
 0x811   :  { %v2426_v13 = vsel %vm2425_vm4, %v2313_v28, %v2424_v29 }
 0x812   :  { %v2427_v34 = vsub.f32 0.0, %v2426_v13 }
 0x814   :  { %v2428_v41 = vmul.f32 1.442695, %v2427_v34 }
 0x816   :  { %3169 = vpow2.f32 %v2428_v41 }
 0x823   :  { %v3170_v11 = vpop.eup %3169 }
 0x824   :  { %v2430_v60 = vadd.f32 1.0, %v3170_v11 }
 0x826   :  { %3171 = vrcp.f32 %v2430_v60 }
 0x833   :  { %v3172_v36 = vpop.eup %3171 }
 0x834   :  { %2434 = vst.msk [vmem:[%s3832_s15] sm:$0x3] %vm2433_vm5, %v3172_v36 }
 0x835   :  { %3257 = dma.done.wait [#allocation4], 768  }
 0x836   :  { %3258 = vsyncadd [#allocation4], 4294966528 }
 0x837   :  { %2454 = vsyncpa [#allocation3], 1 }
 0x838   :  { %2455 = vsyncpa [#allocation6], 1 }
 0x839   :  { %2456 = vsyncpa [#allocation4], 1 }

</bundles_post_ra>
